<compile_context>
chip_gen: v7x
topology: tpu7x:2x2x1
jax: 0.10.0
libtpu: 0.0.40
codegen_flags: <defaults>
</compile_context>

<pallas_src>
import math
import functools

import numpy as np
import jax
import jax.numpy as jnp
from jax import lax
from jax.experimental import pallas as pl
from jax.experimental.pallas import tpu as pltpu


# ---------------------------------------------------------------------------
# Kernel: one query tile of one batch element; K/V cached per batch element.
# ---------------------------------------------------------------------------
def self_attention_kernel(x_ref, cos_ref, sin_ref, wq_ref, wk_ref, wv_ref, wo_ref,
                          o_ref, k_cache, v_cache, *, n_head, head_dim, q_tile):
    hd = head_dim
    hd2 = hd // 2
    D = x_ref.shape[-1]
    D2 = D // 2
    i = pl.program_id(1)

    def rotary_repack(y, cos, sin):
        # y is (rows, D) in the global [all heads' even | all heads' odd] column layout
        # (wrapper permutes wq/wk columns), so the rotation is two full-width FMAs per half
        # (f32 element-wise).  The concat repacks into the per-head-contiguous [even|odd]
        # layout so each head's QK^T is ONE hd-deep contraction.
        y1, y2 = y[:, :D2], y[:, D2:]
        r1 = (y1 * cos - y2 * sin).astype(jnp.bfloat16)
        r2 = (y1 * sin + y2 * cos).astype(jnp.bfloat16)
        return jnp.concatenate(
            [r for h in range(n_head)
             for r in (r1[:, h * hd2:(h + 1) * hd2], r2[:, h * hd2:(h + 1) * hd2])],
            axis=-1)                                                        # (rows, D) bf16

    # ---- K/V cache: projections + K-rotary + bf16 casts run once per batch element ----
    @pl.when(i == 0)
    def _():
        xs = x_ref[0]                                                       # (T, D) bf16
        k = jnp.dot(xs, wk_ref[...], preferred_element_type=jnp.float32)   # (T, D) f32
        v = jnp.dot(xs, wv_ref[...], preferred_element_type=jnp.float32)   # (T, D) f32
        cos_k = jnp.concatenate([cos_ref[...]] * n_head, axis=-1)          # (T, D/2) f32
        sin_k = jnp.concatenate([sin_ref[...]] * n_head, axis=-1)
        k_cache[...] = rotary_repack(k, cos_k, sin_k)       # rotated K, per-head layout
        v_cache[...] = v.astype(jnp.bfloat16)

    # ---- Q projection + rotary for this query tile (wq carries the 1/sqrt(hd) scale) ----
    qstart = pl.multiple_of(i * q_tile, q_tile)
    xq = x_ref[0, pl.ds(qstart, q_tile), :]                                 # (tq, D) bf16
    q = jnp.dot(xq, wq_ref[...], preferred_element_type=jnp.float32)       # (tq, D) f32
    cos_q = jnp.concatenate([cos_ref[pl.ds(qstart, q_tile), :]] * n_head, axis=-1)
    sin_q = jnp.concatenate([sin_ref[pl.ds(qstart, q_tile), :]] * n_head, axis=-1)
    qr = rotary_repack(q, cos_q, sin_q)                                     # (tq, D) bf16

    kr = k_cache[...]                                                       # (T, D) bf16
    vb = v_cache[...]                                                       # (T, D) bf16

    # ---- Per-head attention: one hd-deep QK^T contraction, softmax, PV ----
    dn = (((1,), (1,)), ((), ()))      # contract dim 1 of both operands (no k transpose)
    outs = []
    for h in range(n_head):
        sv = slice(h * hd, (h + 1) * hd)
        scores = lax.dot_general(qr[:, sv], kr[:, sv], dn,
                                 preferred_element_type=jnp.float32)        # (tq, T) f32
        m = jnp.max(scores, axis=-1, keepdims=True)
        e = jnp.exp(scores - m)
        # EUP reciprocal instead of a VALU divide.
        p = e * pl.reciprocal(jnp.sum(e, axis=-1, keepdims=True), approx=True)
        outs.append(jnp.dot(p.astype(jnp.bfloat16), vb[:, sv],
                            preferred_element_type=jnp.float32).astype(jnp.bfloat16))

    out = jnp.concatenate(outs, axis=-1)                                    # (tq, D) bf16
    y = jnp.dot(out, wo_ref[...], preferred_element_type=jnp.float32)       # (tq, D) f32
    o_ref[...] = y[None, :, :].astype(o_ref.dtype)


# ---------------------------------------------------------------------------
# Wrapper
# ---------------------------------------------------------------------------
def _vmem_limit_bytes():
    # Generation-aware VMEM budget: ~75% of physical, capped at 100 MiB.
    # v7x (64 MiB/TC) -> ~48 MiB; v5e/v6e (128 MiB) -> ~96 MiB.
    cap = 64 * 1024 * 1024
    try:
        cap = int(getattr(pltpu.get_tpu_info(), "vmem_capacity_bytes", cap) or cap)
    except Exception:
        pass
    return int(min(cap * 3 // 4, 100 * 1024 * 1024))


def self_attention(x, params, *, n_head, q_tile=512):
    B, T, D = x.shape
    assert D % n_head == 0
    hd = D // n_head
    hd2 = hd // 2
    assert hd % 2 == 0

    tq = T if T <= q_tile else q_tile
    assert T % tq == 0, "sequence length must be divisible by the query tile"
    n_qt = T // tq

    # Compact rotary tables (T, hd/2); broadcast to (., D/2) inside the kernel.
    cos = params["cos"][:T]
    sin = params["sin"][:T]

    # Permute q/k output channels to [all heads' even | all heads' odd] so the rotary is two
    # full-width FMAs in-kernel, and fold the 1/sqrt(head_dim) score scale into wq (exact:
    # rotation commutes with a scalar).  All matmul operands are pre-cast to bf16.
    even = (np.arange(n_head)[:, None] * hd + np.arange(0, hd, 2)[None, :]).reshape(-1)
    perm = np.concatenate([even, even + 1])
    wq = (params["wq"][:, perm] * (1.0 / math.sqrt(hd))).astype(jnp.bfloat16)
    wk = params["wk"][:, perm].astype(jnp.bfloat16)
    wv = params["wv"].astype(jnp.bfloat16)
    wo = params["wo"].astype(jnp.bfloat16)

    # Stream x once, in bf16 (the kernel only feeds bf16 to the MXU anyway): halves the
    # largest DMA stream and removes the old duplicate query input.
    x_bf16 = x.astype(jnp.bfloat16)

    kernel = functools.partial(self_attention_kernel, n_head=n_head, head_dim=hd, q_tile=tq)

    def full2d(arr):
        # Constant-index blocks: DMA'd once, never refreshed.
        return pl.BlockSpec(arr.shape, lambda b, i: (0, 0))

    in_specs = [
        pl.BlockSpec((1, T, D), lambda b, i: (b, 0, 0)),   # x: full sequence, once per b
        full2d(cos), full2d(sin),                          # compact rotary tables
        full2d(wq), full2d(wk), full2d(wv), full2d(wo),
    ]

    return pl.pallas_call(
        kernel,
        out_shape=jax.ShapeDtypeStruct((B, T, D), x.dtype),
        grid=(B, n_qt),
        in_specs=in_specs,
        out_specs=pl.BlockSpec((1, tq, D), lambda b, i: (b, i, 0)),
        scratch_shapes=[
            pltpu.VMEM((T, D), jnp.bfloat16),   # cached rotated K (per-head [even|odd])
            pltpu.VMEM((T, D), jnp.bfloat16),   # cached V
        ],
        compiler_params=pltpu.CompilerParams(
            # B "parallel" (2-TC sharding on v7x); query-tile axis "arbitrary" so the
            # per-batch K/V cache computed at i == 0 is reused by every later tile.
            dimension_semantics=("parallel", "arbitrary"),
            vmem_limit_bytes=_vmem_limit_bytes()),
    )(x_bf16, cos, sin, wq, wk, wv, wo)


# ---------------------------------------------------------------------------
# Parameter init (deterministic, synthetic; weights in (in, out) layout)
# ---------------------------------------------------------------------------
def init_params(key, d_model, n_head, max_seq_len=2048):
    hd = d_model // n_head
    keys = jax.random.split(key, 4)

    def lin(k, din, dout):
        return jax.random.normal(k, (din, dout), jnp.float32) / math.sqrt(din)

    p = {
        "wq": lin(keys[0], d_model, d_model),
        "wk": lin(keys[1], d_model, d_model),
        "wv": lin(keys[2], d_model, d_model),
        "wo": lin(keys[3], d_model, d_model),
    }

    # Rotary buffers, identical to the PyTorch construction.
    inv_freq = 1.0 / (10000.0 ** (jnp.arange(0, hd, 2, dtype=jnp.float32) / hd))
    t = jnp.arange(max_seq_len, dtype=jnp.float32)
    freqs = jnp.outer(t, inv_freq)
    p["cos"] = jnp.cos(freqs)
    p["sin"] = jnp.sin(freqs)
    return p


# ---------------------------------------------------------------------------
# Pure-JAX reference (mirrors the PyTorch forward exactly, f32)
# ---------------------------------------------------------------------------
def reference_self_attention(x, p, *, n_head):
    B, T, D = x.shape
    hd = D // n_head

    def heads(y):
        return y.reshape(B, T, n_head, hd).transpose(0, 2, 1, 3)

    q = heads(x @ p["wq"])
    k = heads(x @ p["wk"])
    v = heads(x @ p["wv"])
    cos = p["cos"][:T][None, None]
    sin = p["sin"][:T][None, None]
    q1, q2 = q[..., ::2], q[..., 1::2]
    k1, k2 = k[..., ::2], k[..., 1::2]
    q = jnp.concatenate([q1 * cos - q2 * sin, q1 * sin + q2 * cos], -1)
    k = jnp.concatenate([k1 * cos - k2 * sin, k1 * sin + k2 * cos], -1)
    s = q @ jnp.swapaxes(k, -1, -2) / math.sqrt(hd)
    a = jax.nn.softmax(s, -1)
    out = (a @ v).transpose(0, 2, 1, 3).reshape(B, T, D)
    return out @ p["wo"]


# ---------------------------------------------------------------------------
if __name__ == "__main__":
    # d_model multiple of 128 -> lane-dense blocks; T=16 with q_tile=8 exercises the
    # multi-tile path (K/V cache reuse across query tiles + dynamic query-row slicing).
    B, T, d_model, n_head = 2, 16, 128, 4

    key = jax.random.PRNGKey(0)
    kx, kp = jax.random.split(key)
    x = jax.random.normal(kx, (B, T, d_model), jnp.float32)
    params = init_params(kp, d_model, n_head)

    out = self_attention(x, params, n_head=n_head, q_tile=8)
    out = jax.block_until_ready(out)

    ref = reference_self_attention(x, params, n_head=n_head)
    assert out.shape == (B, T, d_model)
    max_err = jnp.max(jnp.abs(out - ref))
    # bf16 matmul operands + approx reciprocal -> loosened tolerance (accumulation is f32).
    assert jnp.allclose(out, ref, atol=5e-2, rtol=5e-2), f"max abs err = {max_err}"

    print("KERNEL_OK")
</pallas_src>

<mosaic_0001>
module attributes {stable_mosaic.version = 11 : i64} {
  func.func @self_attention_kernel(%arg0: i32, %arg1: i32, %arg2: memref<1x16x128xbf16, #tpu.memory_space<vmem>>, %arg3: memref<16x16xf32, #tpu.memory_space<vmem>>, %arg4: memref<16x16xf32, #tpu.memory_space<vmem>>, %arg5: memref<128x128xbf16, #tpu.memory_space<vmem>>, %arg6: memref<128x128xbf16, #tpu.memory_space<vmem>>, %arg7: memref<128x128xbf16, #tpu.memory_space<vmem>>, %arg8: memref<128x128xbf16, #tpu.memory_space<vmem>>, %arg9: memref<1x8x128xf32, #tpu.memory_space<vmem>>, %arg10: memref<16x128xbf16, #tpu.memory_space<vmem>>, %arg11: memref<16x128xbf16, #tpu.memory_space<vmem>>) attributes {dimension_semantics = [#tpu.dimension_semantics<parallel>, #tpu.dimension_semantics<arbitrary>], iteration_bounds = array<i64: 2, 2>, scalar_prefetch = 0 : i64, scratch_operands = 2 : i64, tpu.core_type = #tpu.core_type<tc>, window_params = [{transform_indices = @transform_0, window_bounds = array<i64: 1, 16, 128>}, {pipeline_mode = #tpu.pipeline_mode<synchronous>, transform_indices = @transform_1, window_bounds = array<i64: 16, 16>}, {pipeline_mode = #tpu.pipeline_mode<synchronous>, transform_indices = @transform_2, window_bounds = array<i64: 16, 16>}, {pipeline_mode = #tpu.pipeline_mode<synchronous>, transform_indices = @transform_3, window_bounds = array<i64: 128, 128>}, {pipeline_mode = #tpu.pipeline_mode<synchronous>, transform_indices = @transform_4, window_bounds = array<i64: 128, 128>}, {pipeline_mode = #tpu.pipeline_mode<synchronous>, transform_indices = @transform_5, window_bounds = array<i64: 128, 128>}, {pipeline_mode = #tpu.pipeline_mode<synchronous>, transform_indices = @transform_6, window_bounds = array<i64: 128, 128>}, {transform_indices = @transform_7, window_bounds = array<i64: 1, 8, 128>}]} {
    %c0_i32 = arith.constant 0 : i32
    %0 = arith.cmpi eq, %arg1, %c0_i32 : i32
    %1 = arith.extui %0 : i1 to i32
    %c0_i32_0 = arith.constant 0 : i32
    %2 = arith.cmpi ne, %1, %c0_i32_0 : i32
    scf.if %2 {
      %c0_32 = arith.constant 0 : index
      %c0_33 = arith.constant 0 : index
      %c0_34 = arith.constant 0 : index
      %110 = vector.load %arg2[%c0_32, %c0_33, %c0_34] : memref<1x16x128xbf16, #tpu.memory_space<vmem>>, vector<1x16x128xbf16>
      %111 = vector.shape_cast %110 : vector<1x16x128xbf16> to vector<16x128xbf16>
      %c0_35 = arith.constant 0 : index
      %c0_36 = arith.constant 0 : index
      %112 = vector.load %arg6[%c0_35, %c0_36] : memref<128x128xbf16, #tpu.memory_space<vmem>>, vector<128x128xbf16>
      %cst_37 = arith.constant dense<0.000000e+00> : vector<16x128xf32>
      %113 = tpu.matmul %111, %112, %cst_37 {dimension_numbers = #tpu.dot_dimension_numbers<[1], [0], [0], [1], [0, 0, 1, 1], [], []>} : vector<16x128xbf16>, vector<128x128xbf16>, vector<16x128xf32> -> vector<16x128xf32>
      %c0_38 = arith.constant 0 : index
      %c0_39 = arith.constant 0 : index
      %114 = vector.load %arg7[%c0_38, %c0_39] : memref<128x128xbf16, #tpu.memory_space<vmem>>, vector<128x128xbf16>
      %cst_40 = arith.constant dense<0.000000e+00> : vector<16x128xf32>
      %115 = tpu.matmul %111, %114, %cst_40 {dimension_numbers = #tpu.dot_dimension_numbers<[1], [0], [0], [1], [0, 0, 1, 1], [], []>} : vector<16x128xbf16>, vector<128x128xbf16>, vector<16x128xf32> -> vector<16x128xf32>
      %c0_41 = arith.constant 0 : index
      %c0_42 = arith.constant 0 : index
      %116 = vector.load %arg3[%c0_41, %c0_42] : memref<16x16xf32, #tpu.memory_space<vmem>>, vector<16x16xf32>
      %117 = tpu.concatenate %116, %116, %116, %116 in 1 : vector<16x16xf32>, vector<16x16xf32>, vector<16x16xf32>, vector<16x16xf32> -> vector<16x64xf32>
      %c0_43 = arith.constant 0 : index
      %c0_44 = arith.constant 0 : index
      %118 = vector.load %arg4[%c0_43, %c0_44] : memref<16x16xf32, #tpu.memory_space<vmem>>, vector<16x16xf32>
      %119 = tpu.concatenate %118, %118, %118, %118 in 1 : vector<16x16xf32>, vector<16x16xf32>, vector<16x16xf32>, vector<16x16xf32> -> vector<16x64xf32>
      %120 = vector.extract_strided_slice %113 {offsets = [0, 0], sizes = [16, 64], strides = [1, 1]} : vector<16x128xf32> to vector<16x64xf32>
      %121 = vector.extract_strided_slice %113 {offsets = [0, 64], sizes = [16, 64], strides = [1, 1]} : vector<16x128xf32> to vector<16x64xf32>
      %122 = arith.mulf %120, %117 : vector<16x64xf32>
      %123 = arith.mulf %121, %119 : vector<16x64xf32>
      %124 = arith.subf %122, %123 : vector<16x64xf32>
      %125 = arith.truncf %124 : vector<16x64xf32> to vector<16x64xbf16>
      %126 = arith.mulf %120, %119 : vector<16x64xf32>
      %127 = arith.mulf %121, %117 : vector<16x64xf32>
      %128 = arith.addf %126, %127 : vector<16x64xf32>
      %129 = arith.truncf %128 : vector<16x64xf32> to vector<16x64xbf16>
      %130 = vector.extract_strided_slice %125 {offsets = [0, 0], sizes = [16, 16], strides = [1, 1]} : vector<16x64xbf16> to vector<16x16xbf16>
      %131 = vector.extract_strided_slice %129 {offsets = [0, 0], sizes = [16, 16], strides = [1, 1]} : vector<16x64xbf16> to vector<16x16xbf16>
      %132 = vector.extract_strided_slice %125 {offsets = [0, 16], sizes = [16, 16], strides = [1, 1]} : vector<16x64xbf16> to vector<16x16xbf16>
      %133 = vector.extract_strided_slice %129 {offsets = [0, 16], sizes = [16, 16], strides = [1, 1]} : vector<16x64xbf16> to vector<16x16xbf16>
      %134 = vector.extract_strided_slice %125 {offsets = [0, 32], sizes = [16, 16], strides = [1, 1]} : vector<16x64xbf16> to vector<16x16xbf16>
      %135 = vector.extract_strided_slice %129 {offsets = [0, 32], sizes = [16, 16], strides = [1, 1]} : vector<16x64xbf16> to vector<16x16xbf16>
      %136 = vector.extract_strided_slice %125 {offsets = [0, 48], sizes = [16, 16], strides = [1, 1]} : vector<16x64xbf16> to vector<16x16xbf16>
      %137 = vector.extract_strided_slice %129 {offsets = [0, 48], sizes = [16, 16], strides = [1, 1]} : vector<16x64xbf16> to vector<16x16xbf16>
      %138 = tpu.concatenate %130, %131, %132, %133, %134, %135, %136, %137 in 1 : vector<16x16xbf16>, vector<16x16xbf16>, vector<16x16xbf16>, vector<16x16xbf16>, vector<16x16xbf16>, vector<16x16xbf16>, vector<16x16xbf16>, vector<16x16xbf16> -> vector<16x128xbf16>
      %c0_45 = arith.constant 0 : index
      %c0_46 = arith.constant 0 : index
      %139 = vector.load %arg10[%c0_45, %c0_46] : memref<16x128xbf16, #tpu.memory_space<vmem>>, vector<16x128xbf16>
      tpu.vector_store %arg10[%c0_45, %c0_46], %138 {strides = array<i32>} : memref<16x128xbf16, #tpu.memory_space<vmem>>, vector<16x128xbf16>,
      %140 = arith.truncf %115 : vector<16x128xf32> to vector<16x128xbf16>
      %c0_47 = arith.constant 0 : index
      %c0_48 = arith.constant 0 : index
      %141 = vector.load %arg11[%c0_47, %c0_48] : memref<16x128xbf16, #tpu.memory_space<vmem>>, vector<16x128xbf16>
      tpu.vector_store %arg11[%c0_47, %c0_48], %140 {strides = array<i32>} : memref<16x128xbf16, #tpu.memory_space<vmem>>, vector<16x128xbf16>,
    } else {
    }
    %c8_i32 = arith.constant 8 : i32
    %3 = arith.muli %arg1, %c8_i32 : i32
    %4 = tpu.assume_multiple %3, 8 : i32
    %c0 = arith.constant 0 : index
    %5 = arith.index_cast %4 : i32 to index
    %c0_1 = arith.constant 0 : index
    %6 = vector.load %arg2[%c0, %5, %c0_1] : memref<1x16x128xbf16, #tpu.memory_space<vmem>>, vector<1x8x128xbf16>
    %7 = vector.shape_cast %6 : vector<1x8x128xbf16> to vector<8x128xbf16>
    %c0_2 = arith.constant 0 : index
    %c0_3 = arith.constant 0 : index
    %8 = vector.load %arg5[%c0_2, %c0_3] : memref<128x128xbf16, #tpu.memory_space<vmem>>, vector<128x128xbf16>
    %cst = arith.constant dense<0.000000e+00> : vector<8x128xf32>
    %9 = tpu.matmul %7, %8, %cst {dimension_numbers = #tpu.dot_dimension_numbers<[1], [0], [0], [1], [0, 0, 1, 1], [], []>} : vector<8x128xbf16>, vector<128x128xbf16>, vector<8x128xf32> -> vector<8x128xf32>
    %10 = arith.index_cast %4 : i32 to index
    %c0_4 = arith.constant 0 : index
    %11 = vector.load %arg3[%10, %c0_4] : memref<16x16xf32, #tpu.memory_space<vmem>>, vector<8x16xf32>
    %12 = tpu.concatenate %11, %11, %11, %11 in 1 : vector<8x16xf32>, vector<8x16xf32>, vector<8x16xf32>, vector<8x16xf32> -> vector<8x64xf32>
    %13 = arith.index_cast %4 : i32 to index
    %c0_5 = arith.constant 0 : index
    %14 = vector.load %arg4[%13, %c0_5] : memref<16x16xf32, #tpu.memory_space<vmem>>, vector<8x16xf32>
    %15 = tpu.concatenate %14, %14, %14, %14 in 1 : vector<8x16xf32>, vector<8x16xf32>, vector<8x16xf32>, vector<8x16xf32> -> vector<8x64xf32>
    %16 = vector.extract_strided_slice %9 {offsets = [0, 0], sizes = [8, 64], strides = [1, 1]} : vector<8x128xf32> to vector<8x64xf32>
    %17 = vector.extract_strided_slice %9 {offsets = [0, 64], sizes = [8, 64], strides = [1, 1]} : vector<8x128xf32> to vector<8x64xf32>
    %18 = arith.mulf %16, %12 : vector<8x64xf32>
    %19 = arith.mulf %17, %15 : vector<8x64xf32>
    %20 = arith.subf %18, %19 : vector<8x64xf32>
    %21 = arith.truncf %20 : vector<8x64xf32> to vector<8x64xbf16>
    %22 = arith.mulf %16, %15 : vector<8x64xf32>
    %23 = arith.mulf %17, %12 : vector<8x64xf32>
    %24 = arith.addf %22, %23 : vector<8x64xf32>
    %25 = arith.truncf %24 : vector<8x64xf32> to vector<8x64xbf16>
    %26 = vector.extract_strided_slice %21 {offsets = [0, 0], sizes = [8, 16], strides = [1, 1]} : vector<8x64xbf16> to vector<8x16xbf16>
    %27 = vector.extract_strided_slice %25 {offsets = [0, 0], sizes = [8, 16], strides = [1, 1]} : vector<8x64xbf16> to vector<8x16xbf16>
    %28 = vector.extract_strided_slice %21 {offsets = [0, 16], sizes = [8, 16], strides = [1, 1]} : vector<8x64xbf16> to vector<8x16xbf16>
    %29 = vector.extract_strided_slice %25 {offsets = [0, 16], sizes = [8, 16], strides = [1, 1]} : vector<8x64xbf16> to vector<8x16xbf16>
    %30 = vector.extract_strided_slice %21 {offsets = [0, 32], sizes = [8, 16], strides = [1, 1]} : vector<8x64xbf16> to vector<8x16xbf16>
    %31 = vector.extract_strided_slice %25 {offsets = [0, 32], sizes = [8, 16], strides = [1, 1]} : vector<8x64xbf16> to vector<8x16xbf16>
    %32 = vector.extract_strided_slice %21 {offsets = [0, 48], sizes = [8, 16], strides = [1, 1]} : vector<8x64xbf16> to vector<8x16xbf16>
    %33 = vector.extract_strided_slice %25 {offsets = [0, 48], sizes = [8, 16], strides = [1, 1]} : vector<8x64xbf16> to vector<8x16xbf16>
    %34 = tpu.concatenate %26, %27, %28, %29, %30, %31, %32, %33 in 1 : vector<8x16xbf16>, vector<8x16xbf16>, vector<8x16xbf16>, vector<8x16xbf16>, vector<8x16xbf16>, vector<8x16xbf16>, vector<8x16xbf16>, vector<8x16xbf16> -> vector<8x128xbf16>
    %c0_6 = arith.constant 0 : index
    %c0_7 = arith.constant 0 : index
    %35 = vector.load %arg10[%c0_6, %c0_7] : memref<16x128xbf16, #tpu.memory_space<vmem>>, vector<16x128xbf16>
    %c0_8 = arith.constant 0 : index
    %c0_9 = arith.constant 0 : index
    %36 = vector.load %arg11[%c0_8, %c0_9] : memref<16x128xbf16, #tpu.memory_space<vmem>>, vector<16x128xbf16>
    %37 = vector.extract_strided_slice %34 {offsets = [0, 0], sizes = [8, 32], strides = [1, 1]} : vector<8x128xbf16> to vector<8x32xbf16>
    %38 = vector.extract_strided_slice %35 {offsets = [0, 0], sizes = [16, 32], strides = [1, 1]} : vector<16x128xbf16> to vector<16x32xbf16>
    %cst_10 = arith.constant dense<0.000000e+00> : vector<8x16xf32>
    %39 = tpu.matmul %37, %38, %cst_10 {dimension_numbers = #tpu.dot_dimension_numbers<[1], [1], [0], [0], [0, 0, 1, 0], [], []>} : vector<8x32xbf16>, vector<16x32xbf16>, vector<8x16xf32> -> vector<8x16xf32>
    %cst_11 = arith.constant dense<0xFF800000> : vector<8xf32>
    %40 = vector.multi_reduction <maximumf>, %39, %cst_11 [1] : vector<8x16xf32> to vector<8xf32>
    %41 = vector.shape_cast %40 : vector<8xf32> to vector<8x1xf32>
    %42 = vector.broadcast %41 : vector<8x1xf32> to vector<8x16xf32>
    %43 = arith.subf %39, %42 : vector<8x16xf32>
    %44 = math.exp %43 : vector<8x16xf32>
    %cst_12 = arith.constant dense<0.000000e+00> : vector<8xf32>
    %45 = vector.multi_reduction <add>, %44, %cst_12 [1] : vector<8x16xf32> to vector<8xf32>
    %46 = vector.shape_cast %45 : vector<8xf32> to vector<8x1xf32>
    %47 = tpu.reciprocal %46 {approx = true} : vector<8x1xf32> -> vector<8x1xf32>
    %48 = vector.broadcast %47 : vector<8x1xf32> to vector<8x16xf32>
    %49 = arith.mulf %44, %48 : vector<8x16xf32>
    %50 = arith.truncf %49 : vector<8x16xf32> to vector<8x16xbf16>
    %51 = vector.extract_strided_slice %36 {offsets = [0, 0], sizes = [16, 32], strides = [1, 1]} : vector<16x128xbf16> to vector<16x32xbf16>
    %cst_13 = arith.constant dense<0.000000e+00> : vector<8x32xf32>
    %52 = tpu.matmul %50, %51, %cst_13 {dimension_numbers = #tpu.dot_dimension_numbers<[1], [0], [0], [1], [0, 0, 1, 1], [], []>} : vector<8x16xbf16>, vector<16x32xbf16>, vector<8x32xf32> -> vector<8x32xf32>
    %53 = arith.truncf %52 : vector<8x32xf32> to vector<8x32xbf16>
    %54 = vector.extract_strided_slice %34 {offsets = [0, 32], sizes = [8, 32], strides = [1, 1]} : vector<8x128xbf16> to vector<8x32xbf16>
    %55 = vector.extract_strided_slice %35 {offsets = [0, 32], sizes = [16, 32], strides = [1, 1]} : vector<16x128xbf16> to vector<16x32xbf16>
    %cst_14 = arith.constant dense<0.000000e+00> : vector<8x16xf32>
    %56 = tpu.matmul %54, %55, %cst_14 {dimension_numbers = #tpu.dot_dimension_numbers<[1], [1], [0], [0], [0, 0, 1, 0], [], []>} : vector<8x32xbf16>, vector<16x32xbf16>, vector<8x16xf32> -> vector<8x16xf32>
    %cst_15 = arith.constant dense<0xFF800000> : vector<8xf32>
    %57 = vector.multi_reduction <maximumf>, %56, %cst_15 [1] : vector<8x16xf32> to vector<8xf32>
    %58 = vector.shape_cast %57 : vector<8xf32> to vector<8x1xf32>
    %59 = vector.broadcast %58 : vector<8x1xf32> to vector<8x16xf32>
    %60 = arith.subf %56, %59 : vector<8x16xf32>
    %61 = math.exp %60 : vector<8x16xf32>
    %cst_16 = arith.constant dense<0.000000e+00> : vector<8xf32>
    %62 = vector.multi_reduction <add>, %61, %cst_16 [1] : vector<8x16xf32> to vector<8xf32>
    %63 = vector.shape_cast %62 : vector<8xf32> to vector<8x1xf32>
    %64 = tpu.reciprocal %63 {approx = true} : vector<8x1xf32> -> vector<8x1xf32>
    %65 = vector.broadcast %64 : vector<8x1xf32> to vector<8x16xf32>
    %66 = arith.mulf %61, %65 : vector<8x16xf32>
    %67 = arith.truncf %66 : vector<8x16xf32> to vector<8x16xbf16>
    %68 = vector.extract_strided_slice %36 {offsets = [0, 32], sizes = [16, 32], strides = [1, 1]} : vector<16x128xbf16> to vector<16x32xbf16>
    %cst_17 = arith.constant dense<0.000000e+00> : vector<8x32xf32>
    %69 = tpu.matmul %67, %68, %cst_17 {dimension_numbers = #tpu.dot_dimension_numbers<[1], [0], [0], [1], [0, 0, 1, 1], [], []>} : vector<8x16xbf16>, vector<16x32xbf16>, vector<8x32xf32> -> vector<8x32xf32>
    %70 = arith.truncf %69 : vector<8x32xf32> to vector<8x32xbf16>
    %71 = vector.extract_strided_slice %34 {offsets = [0, 64], sizes = [8, 32], strides = [1, 1]} : vector<8x128xbf16> to vector<8x32xbf16>
    %72 = vector.extract_strided_slice %35 {offsets = [0, 64], sizes = [16, 32], strides = [1, 1]} : vector<16x128xbf16> to vector<16x32xbf16>
    %cst_18 = arith.constant dense<0.000000e+00> : vector<8x16xf32>
    %73 = tpu.matmul %71, %72, %cst_18 {dimension_numbers = #tpu.dot_dimension_numbers<[1], [1], [0], [0], [0, 0, 1, 0], [], []>} : vector<8x32xbf16>, vector<16x32xbf16>, vector<8x16xf32> -> vector<8x16xf32>
    %cst_19 = arith.constant dense<0xFF800000> : vector<8xf32>
    %74 = vector.multi_reduction <maximumf>, %73, %cst_19 [1] : vector<8x16xf32> to vector<8xf32>
    %75 = vector.shape_cast %74 : vector<8xf32> to vector<8x1xf32>
    %76 = vector.broadcast %75 : vector<8x1xf32> to vector<8x16xf32>
    %77 = arith.subf %73, %76 : vector<8x16xf32>
    %78 = math.exp %77 : vector<8x16xf32>
    %cst_20 = arith.constant dense<0.000000e+00> : vector<8xf32>
    %79 = vector.multi_reduction <add>, %78, %cst_20 [1] : vector<8x16xf32> to vector<8xf32>
    %80 = vector.shape_cast %79 : vector<8xf32> to vector<8x1xf32>
    %81 = tpu.reciprocal %80 {approx = true} : vector<8x1xf32> -> vector<8x1xf32>
    %82 = vector.broadcast %81 : vector<8x1xf32> to vector<8x16xf32>
    %83 = arith.mulf %78, %82 : vector<8x16xf32>
    %84 = arith.truncf %83 : vector<8x16xf32> to vector<8x16xbf16>
    %85 = vector.extract_strided_slice %36 {offsets = [0, 64], sizes = [16, 32], strides = [1, 1]} : vector<16x128xbf16> to vector<16x32xbf16>
    %cst_21 = arith.constant dense<0.000000e+00> : vector<8x32xf32>
    %86 = tpu.matmul %84, %85, %cst_21 {dimension_numbers = #tpu.dot_dimension_numbers<[1], [0], [0], [1], [0, 0, 1, 1], [], []>} : vector<8x16xbf16>, vector<16x32xbf16>, vector<8x32xf32> -> vector<8x32xf32>
    %87 = arith.truncf %86 : vector<8x32xf32> to vector<8x32xbf16>
    %88 = vector.extract_strided_slice %34 {offsets = [0, 96], sizes = [8, 32], strides = [1, 1]} : vector<8x128xbf16> to vector<8x32xbf16>
    %89 = vector.extract_strided_slice %35 {offsets = [0, 96], sizes = [16, 32], strides = [1, 1]} : vector<16x128xbf16> to vector<16x32xbf16>
    %cst_22 = arith.constant dense<0.000000e+00> : vector<8x16xf32>
    %90 = tpu.matmul %88, %89, %cst_22 {dimension_numbers = #tpu.dot_dimension_numbers<[1], [1], [0], [0], [0, 0, 1, 0], [], []>} : vector<8x32xbf16>, vector<16x32xbf16>, vector<8x16xf32> -> vector<8x16xf32>
    %cst_23 = arith.constant dense<0xFF800000> : vector<8xf32>
    %91 = vector.multi_reduction <maximumf>, %90, %cst_23 [1] : vector<8x16xf32> to vector<8xf32>
    %92 = vector.shape_cast %91 : vector<8xf32> to vector<8x1xf32>
    %93 = vector.broadcast %92 : vector<8x1xf32> to vector<8x16xf32>
    %94 = arith.subf %90, %93 : vector<8x16xf32>
    %95 = math.exp %94 : vector<8x16xf32>
    %cst_24 = arith.constant dense<0.000000e+00> : vector<8xf32>
    %96 = vector.multi_reduction <add>, %95, %cst_24 [1] : vector<8x16xf32> to vector<8xf32>
    %97 = vector.shape_cast %96 : vector<8xf32> to vector<8x1xf32>
    %98 = tpu.reciprocal %97 {approx = true} : vector<8x1xf32> -> vector<8x1xf32>
    %99 = vector.broadcast %98 : vector<8x1xf32> to vector<8x16xf32>
    %100 = arith.mulf %95, %99 : vector<8x16xf32>
    %101 = arith.truncf %100 : vector<8x16xf32> to vector<8x16xbf16>
    %102 = vector.extract_strided_slice %36 {offsets = [0, 96], sizes = [16, 32], strides = [1, 1]} : vector<16x128xbf16> to vector<16x32xbf16>
    %cst_25 = arith.constant dense<0.000000e+00> : vector<8x32xf32>
    %103 = tpu.matmul %101, %102, %cst_25 {dimension_numbers = #tpu.dot_dimension_numbers<[1], [0], [0], [1], [0, 0, 1, 1], [], []>} : vector<8x16xbf16>, vector<16x32xbf16>, vector<8x32xf32> -> vector<8x32xf32>
    %104 = arith.truncf %103 : vector<8x32xf32> to vector<8x32xbf16>
    %105 = tpu.concatenate %53, %70, %87, %104 in 1 : vector<8x32xbf16>, vector<8x32xbf16>, vector<8x32xbf16>, vector<8x32xbf16> -> vector<8x128xbf16>
    %c0_26 = arith.constant 0 : index
    %c0_27 = arith.constant 0 : index
    %106 = vector.load %arg8[%c0_26, %c0_27] : memref<128x128xbf16, #tpu.memory_space<vmem>>, vector<128x128xbf16>
    %cst_28 = arith.constant dense<0.000000e+00> : vector<8x128xf32>
    %107 = tpu.matmul %105, %106, %cst_28 {dimension_numbers = #tpu.dot_dimension_numbers<[1], [0], [0], [1], [0, 0, 1, 1], [], []>} : vector<8x128xbf16>, vector<128x128xbf16>, vector<8x128xf32> -> vector<8x128xf32>
    %108 = vector.shape_cast %107 : vector<8x128xf32> to vector<1x8x128xf32>
    %c0_29 = arith.constant 0 : index
    %c0_30 = arith.constant 0 : index
    %c0_31 = arith.constant 0 : index
    %109 = vector.load %arg9[%c0_29, %c0_30, %c0_31] : memref<1x8x128xf32, #tpu.memory_space<vmem>>, vector<1x8x128xf32>
    tpu.vector_store %arg9[%c0_29, %c0_30, %c0_31], %108 {strides = array<i32>} : memref<1x8x128xf32, #tpu.memory_space<vmem>>, vector<1x8x128xf32>,
    return
  }
  func.func @transform_0(%arg0: i32, %arg1: i32) -> (i32, i32, i32) {
    %c0_i32 = arith.constant 0 : i32
    %c0_i32_0 = arith.constant 0 : i32
    %c0_i32_1 = arith.constant 0 : i32
    return %arg0, %c0_i32, %c0_i32_0 : i32, i32, i32
  }
  func.func @transform_1(%arg0: i32, %arg1: i32) -> (i32, i32) {
    %c0_i32 = arith.constant 0 : i32
    %c0_i32_0 = arith.constant 0 : i32
    %c0_i32_1 = arith.constant 0 : i32
    return %c0_i32, %c0_i32_0 : i32, i32
  }
  func.func @transform_2(%arg0: i32, %arg1: i32) -> (i32, i32) {
    %c0_i32 = arith.constant 0 : i32
    %c0_i32_0 = arith.constant 0 : i32
    %c0_i32_1 = arith.constant 0 : i32
    return %c0_i32, %c0_i32_0 : i32, i32
  }
  func.func @transform_3(%arg0: i32, %arg1: i32) -> (i32, i32) {
    %c0_i32 = arith.constant 0 : i32
    %c0_i32_0 = arith.constant 0 : i32
    %c0_i32_1 = arith.constant 0 : i32
    return %c0_i32, %c0_i32_0 : i32, i32
  }
  func.func @transform_4(%arg0: i32, %arg1: i32) -> (i32, i32) {
    %c0_i32 = arith.constant 0 : i32
    %c0_i32_0 = arith.constant 0 : i32
    %c0_i32_1 = arith.constant 0 : i32
    return %c0_i32, %c0_i32_0 : i32, i32
  }
  func.func @transform_5(%arg0: i32, %arg1: i32) -> (i32, i32) {
    %c0_i32 = arith.constant 0 : i32
    %c0_i32_0 = arith.constant 0 : i32
    %c0_i32_1 = arith.constant 0 : i32
    return %c0_i32, %c0_i32_0 : i32, i32
  }
  func.func @transform_6(%arg0: i32, %arg1: i32) -> (i32, i32) {
    %c0_i32 = arith.constant 0 : i32
    %c0_i32_0 = arith.constant 0 : i32
    %c0_i32_1 = arith.constant 0 : i32
    return %c0_i32, %c0_i32_0 : i32, i32
  }
  func.func @transform_7(%arg0: i32, %arg1: i32) -> (i32, i32, i32) {
    %c0_i32 = arith.constant 0 : i32
    %c0_i32_0 = arith.constant 0 : i32
    return %arg0, %arg1, %c0_i32 : i32, i32, i32
  }
}

</mosaic_0001>

<bundles_post_ra>
// kernel: tpu_custom_call.1
= control target key start
LH: loop header
LB: loop body
LE: loop exit
PB: predicated region body
PF: predicated region fallthrough
CT: control target
= control target key end

     0   :  { %s3190_s0 = inlined_call_operand.hbm [shape: bf16[2,16,128], index: 0, kind: input, shape index: {}]   ;;  %s3191_s1 = inlined_call_operand.hbm [shape: f32[16,16], index: 1, kind: input, shape index: {}]   ;;  %s3192_s2 = inlined_call_operand.hbm [shape: f32[16,16], index: 2, kind: input, shape index: {}]   ;;  %s3193_s3 = inlined_call_operand.hbm [shape: bf16[128,128], index: 3, kind: input, shape index: {}]   ;;  %s3194_s4 = inlined_call_operand.hbm [shape: bf16[128,128], index: 4, kind: input, shape index: {}]   ;;  %s3195_s5 = inlined_call_operand.hbm [shape: bf16[128,128], index: 5, kind: input, shape index: {}]   ;;  %s3196_s6 = inlined_call_operand.hbm [shape: bf16[128,128], index: 6, kind: input, shape index: {}]   ;;  %s3197_s7 = inlined_call_operand.hbm [shape: f32[2,16,128], index: 7, kind: output, shape index: {}]  }
   0x1   :  { %3214 = sst [smem:[#allocation28_spill]] %s3190_s0 }
   0x2   :  { %3215 = sst [smem:[#allocation29_spill]] %s3191_s1 }
   0x3   :  { %3216 = sst [smem:[#allocation30_spill]] %s3192_s2 }
   0x4   :  { %3217 = sst [smem:[#allocation31_spill]] %s3193_s3 }
   0x5   :  { %3218 = sst [smem:[#allocation32_spill]] %s3197_s7 }
   0x6   :  { %12 = vsyncpa [#allocation5], 0 }
   0x7   :  { %14 = vsyncpa [#allocation5 + $0x1], 0 }
   0x8   :  { %15 = vsyncpa [#allocation8], 0 }
   0x9   :  { %16 = vsyncpa [#allocation11], 0 }
   0xa   :  { %17 = vsyncpa [#allocation14], 0 }
   0xb   :  { %18 = vsyncpa [#allocation6], 0 }
   0xc   :  { %20 = vsyncpa [#allocation6 + $0x1], 0  ;;  %s2564_s24 = smov 0   ;;  %s2566_s25 = smov 0  }
   0xd   :  { %s2568_s26 = smov 0   ;;  %s2570_s27 = smov 0  }
   0xe   :  { %s2572_s28 = smov 0   ;;  %s2574_s29 = smov 0  }
   0xf   :  { %s2576_s30 = smov 0   ;;  %s2578_s8 = smov 0  }
  0x10   :  { %s2580_s9 = smov 0   ;;  %s2582_s10 = smov 0  }
  0x11   :  { %s2584_s11 = smov 0  }
  0x12 LB: > { %3219 = sst [smem:[#allocation22_spill]] %s2457_s24  ;;  %s1684_s12 = sadd.s32 4294967295, %s2497_s11   ;;  %s2497_s11 = sphi %s2584_s11, %s26_s11   ;;  %s2493_s10 = sphi %s2582_s10, %s3271_s10   ;;  %s2489_s9 = sphi %s2580_s9, %s3270_s9   ;;  %s2485_s8 = sphi %s2578_s8, %s3269_s8   ;;  %s2481_s30 = sphi %s2576_s30, %s3268_s30   ;;  %s2477_s29 = sphi %s2574_s29, %s3267_s29   ;;  %s2473_s28 = sphi %s2572_s28, %s3266_s28   ;;  %s2469_s27 = sphi %s2570_s27, %s3265_s27   ;;  %s2465_s26 = sphi %s2568_s26, %s3264_s26   ;;  %s2461_s25 = sphi %s2566_s25, %s3263_s25   ;;  %s2457_s24 = sphi %s2564_s24, %s3261_s24  }
  0x13   : > { %3220 = sst [smem:[#allocation23_spill]] %s2461_s25  ;;  %p1686_p0 = scmp.ge.s32.totalorder %s2497_s11, 1 }
  0x14   : > { %3221 = sst [smem:[#allocation24_spill]] %s2481_s30  ;;  %p2621_p1 = scmp.eq.s32.totalorder %s1684_s12, 0 }
  0x15   : > { %3222 = sst [smem:[#allocation25_spill]] %s2485_s8  ;;  %p2625_p2 = scmp.eq.s32.totalorder %s1684_s12, 3 }
  0x16   : > { %s3223_s13 = scalar_select %p2621_p1, 1, 0 }
  0x17   : > { %s3224_s14 = scalar_select %p2625_p2, 1, 0 }
  0x18   : > { %p223_p3 = scmp.lt.s32.totalorder %s2497_s11, 5  ;;  %s2499_s16 = smov [#allocation7]  }
  0x19   : > { %3225 = sst [smem:[#allocation26_spill]] %s3224_s14  ;;  %s235_s17 = sshll.u32 %s2499_s16, 4  ;;  %s236_s17 = int_to_ptr.vmem [resolvable:$true] %s235_s17 }
  0x1a   : > { %p2630_p4 = pnand %p1686_p0, %p223_p3  ;;  %s2500_s19 = smov [#allocation10]  }
  0x1b   : > { %s261_s20 = sshll.u32 %s2500_s19, 4  ;;  %s3229_s1 = sld [smem:[#allocation29_spill]]  ;;  %s2642_s20 = int_to_ptr.vmem [resolvable:$true] %s261_s20 }
  0x1c   : > { %s3226_s15 = scalar_select %p2630_p4, 1, 0 }
  0x1d   : > { %p1964_p5 = pneg %p2630_p4 }
  0x1e   : > { %3227 = sst [smem:[#allocation27_spill]] %s3226_s15 }
  0x1f   : > { %p2638_p6 = pnand %p1964_p5, %p2621_p1 }
  0x21   : > { %s2165_s23 = scalar_lea.hbm %s3229_s1, 256  ;;  %p2652_p8 = pneg %p2638_p6 }
  0x22   : > { %p2166_p7 = scmp.ne.s32.totalorder %s3229_s1, %s2165_s23  ;;  %p2172_p11 = scmp.lt.u32.totalorder %s2165_s23, %s3229_s1 }
  0x24   : > { %p2168_p9 = pnand %p2652_p8, %p2166_p7 }
  0x26   : > { %p2169_p10 = pneg %p2168_p9 }
  0x28   : > { %p2174_p12 = pnand %p2172_p11, %p2169_p10 }
  0x2a   : > { %2177 = shalt.err (!%p2174_p12)
}
  0x2b   : > { %s2178_s21 = scalar_lea.vmem %s236_s17, 256  ;;  %p2186_p5 = scmp.lt.s32.totalorder %s236_s17, %s236_s17 }
  0x2c   : > { %p2179_p13 = scmp.ne.s32.totalorder %s236_s17, %s2178_s21  ;;  %p2187_p4 = scmp.lt.s32.totalorder %s2178_s21, %s2178_s21 }
  0x2e   : > { %p2181_p0 = pnand %p2179_p13, %p2652_p8  ;;  %p2188_p2 = por %p2187_p4, %p2186_p5 }
  0x30   : > { %p2182_p3 = pneg %p2181_p0 }
  0x32   : > { %p2189_p1 = pnand %p2188_p2, %p2182_p3 }
  0x34   : > { %2192 = shalt.err (!%p2189_p1)
}
  0x35   : > { %s3206_s7 = smov 128   ;;  %s3207_s22 = smov 8  }
  0x36   : > { %1967 = dma.hbm_to_vmem [thread:$0]  (!%p2638_p6), %s3229_s1, 256, %s236_s17, [#allocation8], %s3206_s7, %s3206_s7, %s3207_s22  }
  0x37   : > { %s3231_s3 = sld [smem:[#allocation31_spill]] }
  0x3d   : > { %s2193_s30 = scalar_lea.hbm %s3231_s3, 1024 }
  0x3e   : > { %p2194_p1 = scmp.ne.s32.totalorder %s3231_s3, %s2193_s30  ;;  %p2200_p7 = scmp.lt.u32.totalorder %s2193_s30, %s3231_s3 }
  0x40   : > { %p2196_p2 = pnand %p2194_p1, %p2652_p8 }
  0x42   : > { %p2197_p4 = pneg %p2196_p2 }
  0x44   : > { %p2202_p9 = pnand %p2200_p7, %p2197_p4 }
  0x46   : > { %2205 = shalt.err (!%p2202_p9)
}
  0x47   : > { %s2206_s17 = scalar_lea.vmem %s2642_s20, 1024  ;;  %p2214_p13 = scmp.lt.s32.totalorder %s2642_s20, %s2642_s20 }
  0x48   : > { %p2207_p10 = scmp.ne.s32.totalorder %s2642_s20, %s2206_s17  ;;  %p2215_p0 = scmp.lt.s32.totalorder %s2206_s17, %s2206_s17 }
  0x4a   : > { %p2209_p11 = pnand %p2207_p10, %p2652_p8  ;;  %p2216_p3 = por %p2215_p0, %p2214_p13 }
  0x4c   : > { %p2210_p12 = pneg %p2209_p11 }
  0x4e   : > { %p2217_p5 = pnand %p2216_p3, %p2210_p12 }
  0x50   : > { %2220 = shalt.err (!%p2217_p5)
}
  0x51   : > { %s3210_s15 = smov 64   ;;  %s3212_s0 = smov 4  }
  0x52   : > { %1973 = dma.hbm_to_vmem [thread:$0]  (!%p2638_p6), %s3231_s3, 1024, %s2642_s20, [#allocation11], %s3210_s15, %s3210_s15, %s3212_s0  }
  0x53   : > { %s2505_s8 = smov [#allocation13]   ;;  %s2506_s12 = smov [#allocation9]  }
  0x54   : > { %s287_s23 = sshll.u32 %s2505_s8, 4  ;;  %s248_s19 = sshll.u32 %s2506_s12, 4  ;;  %s288_s23 = int_to_ptr.vmem [resolvable:$true] %s287_s23  ;;  %s249_s19 = int_to_ptr.vmem [resolvable:$true] %s248_s19 }
  0x55   : > { %s2221_s7 = scalar_lea.hbm %s3195_s5, 1024 }
  0x56   : > { %p2222_p1 = scmp.ne.s32.totalorder %s3195_s5, %s2221_s7  ;;  %p2228_p7 = scmp.lt.u32.totalorder %s2221_s7, %s3195_s5 }
  0x58   : > { %p2224_p2 = pnand %p2222_p1, %p2652_p8 }
  0x5a   : > { %p2225_p4 = pneg %p2224_p2 }
  0x5c   : > { %p2230_p9 = pnand %p2228_p7, %p2225_p4 }
  0x5e   : > { %2233 = shalt.err (!%p2230_p9)
}
  0x5f   : > { %s2234_s20 = scalar_lea.vmem %s288_s23, 1024  ;;  %p2242_p13 = scmp.lt.s32.totalorder %s288_s23, %s288_s23 }
  0x60   : > { %p2235_p10 = scmp.ne.s32.totalorder %s288_s23, %s2234_s20  ;;  %p2243_p0 = scmp.lt.s32.totalorder %s2234_s20, %s2234_s20 }
  0x62   : > { %p2237_p11 = pnand %p2235_p10, %p2652_p8  ;;  %p2244_p3 = por %p2243_p0, %p2242_p13 }
  0x64   : > { %p2238_p12 = pneg %p2237_p11 }
  0x66   : > { %p2245_p5 = pnand %p2244_p3, %p2238_p12 }
  0x68   : > { %2248 = shalt.err (!%p2245_p5)
}
  0x69   : > { %1979 = dma.hbm_to_vmem [thread:$0]  (!%p2638_p6), %s3195_s5, 1024, %s288_s23, [#allocation14], %s3210_s15, %s3210_s15, %s3212_s0  }
  0x6a   : > { %s3232_s2 = sld [smem:[#allocation30_spill]] }
  0x70   : > { %s2249_s22 = scalar_lea.hbm %s3232_s2, 256 }
  0x71   : > { %p2250_p1 = scmp.ne.s32.totalorder %s3232_s2, %s2249_s22  ;;  %p2256_p7 = scmp.lt.u32.totalorder %s2249_s22, %s3232_s2 }
  0x73   : > { %p2252_p2 = pnand %p2250_p1, %p2652_p8 }
  0x75   : > { %p2253_p4 = pneg %p2252_p2 }
  0x77   : > { %p2258_p9 = pnand %p2256_p7, %p2253_p4 }
  0x79   : > { %2261 = shalt.err (!%p2258_p9)
}
  0x7a   : > { %s2262_s21 = scalar_lea.vmem %s249_s19, 256  ;;  %p2270_p13 = scmp.lt.s32.totalorder %s249_s19, %s249_s19 }
  0x7b   : > { %p2263_p10 = scmp.ne.s32.totalorder %s249_s19, %s2262_s21  ;;  %p2271_p0 = scmp.lt.s32.totalorder %s2262_s21, %s2262_s21 }
  0x7d   : > { %p2265_p11 = pnand %p2263_p10, %p2652_p8  ;;  %p2272_p3 = por %p2271_p0, %p2270_p13 }
  0x7f   : > { %p2266_p12 = pneg %p2265_p11 }
  0x81   : > { %p2273_p5 = pnand %p2272_p3, %p2266_p12 }
  0x83   : > { %2276 = shalt.err (!%p2273_p5)
}
  0x84   : > { %s3233_s23 = smov 8   ;;  %s3234_s17 = smov 128  }
  0x85   : > { %1970 = dma.hbm_to_vmem [thread:$0]  (!%p2638_p6), %s3232_s2, 256, %s249_s19, [#allocation8], %s3234_s17, %s3234_s17, %s3233_s23  }
  0x86   : > { %s2507_s24 = smov [#allocation12]   ;;  %s2508_s7 = smov [#allocation15]  }
  0x87   : > { %s274_s25 = sshll.u32 %s2507_s24, 4  ;;  %s300_s22 = sshll.u32 %s2508_s7, 4  ;;  %s275_s25 = int_to_ptr.vmem [resolvable:$true] %s274_s25  ;;  %s301_s22 = int_to_ptr.vmem [resolvable:$true] %s300_s22 }
  0x88   : > { %s2277_s8 = scalar_lea.hbm %s3194_s4, 1024 }
  0x89   : > { %p2278_p1 = scmp.ne.s32.totalorder %s3194_s4, %s2277_s8  ;;  %p2284_p7 = scmp.lt.u32.totalorder %s2277_s8, %s3194_s4 }
  0x8b   : > { %p2280_p2 = pnand %p2278_p1, %p2652_p8 }
  0x8d   : > { %p2281_p4 = pneg %p2280_p2 }
  0x8f   : > { %p2286_p9 = pnand %p2284_p7, %p2281_p4 }
  0x91   : > { %2289 = shalt.err (!%p2286_p9)
}
  0x92   : > { %s2290_s19 = scalar_lea.vmem %s275_s25, 1024  ;;  %p2298_p13 = scmp.lt.s32.totalorder %s275_s25, %s275_s25 }
  0x93   : > { %p2291_p10 = scmp.ne.s32.totalorder %s275_s25, %s2290_s19  ;;  %p2299_p0 = scmp.lt.s32.totalorder %s2290_s19, %s2290_s19 }
  0x95   : > { %p2293_p11 = pnand %p2291_p10, %p2652_p8  ;;  %p2300_p3 = por %p2299_p0, %p2298_p13 }
  0x97   : > { %p2294_p12 = pneg %p2293_p11 }
  0x99   : > { %p2301_p5 = pnand %p2300_p3, %p2294_p12 }
  0x9b   : > { %2304 = shalt.err (!%p2301_p5)
}
  0x9c   : > { %s3235_s23 = smov 64   ;;  %s2305_s7 = scalar_lea.hbm %s3196_s6, 1024 }
  0x9d   : > { %1976 = dma.hbm_to_vmem [thread:$0]  (!%p2638_p6), %s3194_s4, 1024, %s275_s25, [#allocation11], %s3235_s23, %s3235_s23, %s3212_s0  }
  0x9e   : > { %p2306_p1 = scmp.ne.s32.totalorder %s3196_s6, %s2305_s7  ;;  %p2312_p7 = scmp.lt.u32.totalorder %s2305_s7, %s3196_s6 }
  0xa0   : > { %p2308_p2 = pnand %p2306_p1, %p2652_p8 }
  0xa2   : > { %p2309_p4 = pneg %p2308_p2 }
  0xa4   : > { %p2314_p9 = pnand %p2312_p7, %p2309_p4 }
  0xa6   : > { %2317 = shalt.err (!%p2314_p9)
}
  0xa7   : > { %s2318_s21 = scalar_lea.vmem %s301_s22, 1024  ;;  %p2326_p13 = scmp.lt.s32.totalorder %s301_s22, %s301_s22 }
  0xa8   : > { %p2319_p10 = scmp.ne.s32.totalorder %s301_s22, %s2318_s21  ;;  %p2327_p0 = scmp.lt.s32.totalorder %s2318_s21, %s2318_s21 }
  0xaa   : > { %p2321_p11 = pnand %p2319_p10, %p2652_p8  ;;  %p2328_p3 = por %p2327_p0, %p2326_p13 }
  0xac   : > { %p2322_p12 = pneg %p2321_p11 }
  0xae   : > { %p2329_p5 = pnand %p2328_p3, %p2322_p12 }
  0xb0   : > { %2332 = shalt.err (!%p2329_p5)
}
  0xb1   : > { %1982 = dma.hbm_to_vmem [thread:$0]  (!%p2638_p6), %s3196_s6, 1024, %s301_s22, [#allocation14], %s3235_s23, %s3235_s23, %s3212_s0  }
  0xb2   : > { %s1685_s18 = sadd.s32 4294967294, %s2497_s11   ;;  %s3236_s16 = sld [smem:[#allocation23_spill]] }
  0xb3   : > { %s35_s19 = sadd.s32 1, %s2489_s9  ;;  %s3237_s15 = sld [smem:[#allocation22_spill]] }
  0xb4   : > { %s38_s17 = sadd.s32 1, %s2493_s10  ;;  %p36_p8 = scmp.ge.s32.totalorder %s35_s19, 2 }
  0xb5   : > { %s45_s1 = sadd.s32 1, %s2477_s29  ;;  %p52_p1 = scmp.ne.s32.totalorder %s2477_s29, %s2473_s28 }
  0xb6   : > { %p53_p2 = scmp.eq.s32.totalorder %s2497_s11, 0  ;;  %s3273_s19 = smov (%p36_p8, %s35_s19), 0 }
  0xb7   : > { %s3238_s24 = sld [smem:[#allocation26_spill]]  ;;  %s3275_s17 = smov (!%p36_p8, %s38_s17), %s2493_s10 }
  0xb8   : > { %p2791_p4 = por %p53_p2, %p52_p1  ;;  %p58_p6 = scmp.ne.s32.totalorder %s2473_s28, %s2469_s27 }
  0xb9   : > { %p40_p7 = scmp.ge.s32.totalorder %s3275_s17, 2  ;;  %s195_s7 = ssub.s32 %s2489_s9, %s3273_s19 }
  0xba   : > { %p3240_p9 = scmp.ne.s32.totalorder %s3223_s13, 0  ;;  %s199_s14 = sadd.s32 1, %s2465_s26 }
  0xbb   : > { %s3277_s17 = smov (%p40_p7, %s3275_s17), 0  ;;  %p209_p11 = scmp.ne.s32.totalorder %s2465_s26, %s3236_s16 }
  0xbc   : > { %p2801_p10 = por %p3240_p9, %p58_p6  ;;  %p215_p12 = scmp.ne.s32.totalorder %s3236_s16, %s3237_s15 }
  0xbd   : > { %s42_s8 = ssub.s32 %s2493_s10, %s3277_s17  ;;  %p216_p13 = scmp.eq.s32.totalorder %s1685_s18, 3 }
  0xbe   : > { %p43_p0 = scmp.eq.s32.totalorder %s42_s8, 0  ;;  %s196_s27 = sor.u32 %s195_s7, %s42_s8 }
  0xbf   : > { %p197_p3 = scmp.eq.s32.totalorder %s196_s27, 0  ;;  %p3242_p5 = scmp.ne.s32.totalorder %s3238_s24, 0 }
  0xc0   : > { %s2821_s21 = scalar_select %p43_p0, %s2477_s29, %s45_s1  }
  0xc1   : > { %p2816_p8 = por %p3242_p5, %p209_p11  ;;  %p2826_p1 = por %p216_p13, %p215_p12 }
  0xc2   : > { %s2824_s25 = scalar_select %p197_p3, %s2465_s26, %s199_s14  }
  0xc3   : > { %s3243_s12 = scalar_select %p2816_p8, 1, 0 }
  0xc4   : > { %s3244_s20 = scalar_select %p2826_p1, 1, 0 }
  0xc5   : > { %p1997_p2 = scmp.lt.s32.totalorder %s2497_s11, 4  ;;  %s314_s16 = sand.u32 1, %s2477_s29  }
  0xc6   : > { %s1755_s15 = sshll.u32 %s2493_s10, 7  ;;  %s1694_s18 = sshll.u32 %s314_s16, 3 }
  0xc7   : > { %s3245_s8 = sld [smem:[#allocation28_spill]]  ;;  %s318_s1 = scalar_lea.vmem [#allocation4], %s1694_s18 }
  0xc8   : > { %s325_s14 = sshll.u32 %s318_s1, 4  ;;  %p2840_p6 = pnand %p1997_p2, %p2791_p4  ;;  %s2844_s14 = int_to_ptr.vmem [resolvable:$true] %s325_s14 }
  0xc9   : > { %s2846_s3 = scalar_lea.sflag [#allocation5], %s314_s16 }
  0xca   : > { %p2335_p9 = pneg %p2840_p6 }
  0xcd   : > { %s3246_s2 = smov %s3245_s8  ;;  %s2836_s24 = scalar_lea.hbm %s3245_s8, %s1755_s15 }
  0xce   : > { %s2333_s0 = scalar_lea.hbm %s2836_s24, 128  ;;  %s2338_s18 = scalar_lea.hbm %s3246_s2, 256 }
  0xcf   : > { %p2334_p7 = scmp.ne.s32.totalorder %s2836_s24, %s2333_s0  ;;  %p2339_p4 = scmp.lt.u32.totalorder %s2836_s24, %s3246_s2 }
  0xd0   : > { %p2340_p13 = scmp.lt.u32.totalorder %s2338_s18, %s2333_s0  ;;  %p2342_p3 = scmp.lt.u32.totalorder %s2333_s0, %s2836_s24 }
  0xd1   : > { %p2336_p11 = pnand %p2335_p9, %p2334_p7 }
  0xd2   : > { %p2341_p0 = por %p2340_p13, %p2339_p4 }
  0xd3   : > { %p2337_p12 = pneg %p2336_p11 }
  0xd4   : > { %p2343_p5 = por %p2342_p3, %p2341_p0 }
  0xd6   : > { %p2344_p2 = pnand %p2343_p5, %p2337_p12 }
  0xd8   : > { %2347 = shalt.err (!%p2344_p2)
}
  0xd9   : > { %s2348_s16 = scalar_lea.vmem %s2844_s14, 128  ;;  %s2509_s1 = smov [#allocation4]  }
  0xda   : > { %p2349_p7 = scmp.ne.s32.totalorder %s2844_s14, %s2348_s16  ;;  %s2353_s15 = sshll.u32 %s2509_s1, 4  ;;  %s2354_s15 = int_to_ptr.vmem [resolvable:$false] %s2353_s15 }
  0xdb   : > { %s2355_s22 = scalar_lea.vmem %s2354_s15, 256  ;;  %p2356_p8 = scmp.lt.s32.totalorder %s2844_s14, %s2354_s15 }
  0xdc   : > { %p2351_p11 = pnand %p2349_p7, %p2335_p9  ;;  %p2357_p4 = scmp.lt.s32.totalorder %s2355_s22, %s2348_s16 }
  0xde   : > { %p2352_p1 = pneg %p2351_p11  ;;  %p2358_p13 = por %p2357_p4, %p2356_p8 }
  0xe0   : > { %p2359_p0 = pnand %p2358_p13, %p2352_p1 }
  0xe2   : > { %2362 = shalt.err (!%p2359_p0)
}
  0xe3   : > { %s3248_s0 = smov 4   ;;  %s3249_s18 = sld [smem:[#allocation27_spill]] }
  0xe4   : > { %1986 = dma.hbm_to_vmem [thread:$0]  (!%p2840_p6), %s2836_s24, 128, %s2844_s14, %s2846_s3, %s3235_s23, %s3235_s23, %s3248_s0  }
  0xe9   : > { %p3250_p9 = scmp.ne.s32.totalorder %s3249_s18, 0 }
  0xea   : > { %s339_s7 = sand.u32 (!%p3250_p9), 1, %s2473_s28  }
  0xeb   : > { %337 = sbr.rel (%p3250_p9) target bundleno = 3946 (0xf6a), region = 48  ;;  %s2880_s8 = sshll.u32 (!%p3250_p9), %s339_s7, 3 }
  0xec   : > { %s340_s16 = scalar_lea.sflag (!%p3250_p9), [#allocation5], %s339_s7  ;;  %s343_s1 = scalar_lea.vmem (!%p3250_p9), [#allocation4], %s2880_s8 }
  0xf2   : > { %2436 = dma.done.wait (%p2801_p10), %s340_s16, 128  }
  0xf3   : > { %2438 = vsyncadd (%p2801_p10), %s340_s16, 4294967168  ;;  %p3251_p8 = scmp.ne.s32.totalorder %s3223_s13, 0 }
  0xf5   : > { %2440 = dma.done.wait (%p3251_p8), [#allocation8], 512  }
  0xf6   : > { %2442 = vsyncadd (%p3251_p8), [#allocation8], 4294966784 }
  0xf7   : > { %2444 = dma.done.wait (%p3251_p8), [#allocation11], 2048  }
  0xf8   : > { %2446 = vsyncadd (%p3251_p8), [#allocation11], 4294965248 }
  0xf9   : > { %2448 = dma.done.wait (%p3251_p8), [#allocation14], 2048  }
  0xfa   : > { %2450 = vsyncadd (%p3251_p8), [#allocation14], 4294965248  ;;  %s3252_s3 = sld [smem:[#allocation23_spill]]  ;;  %s3253_s14 = sld [smem:[#allocation24_spill]] }
 0x100   : > { %s395_s23 = sand.u32 1, %s3252_s3   ;;  %p1706_p10 = scmp.ne.s32.totalorder %s3253_s14, 0 }
 0x101   : > { %s2902_s30 = sshll.u32 %s395_s23, 3  ;;  %v621_v0 = vld [vmem:[#allocation7] sm:$0xff] (!%p1706_p10)  ;;  %s2510_s27 = smov (!%p1706_p10), 32   ;;  %v2512_v2 = vmov (!%p1706_p10), 0.0   ;;  %v622_v3 = vld [vmem:[#allocation7 + $0x8] sm:$0xff] (!%p1706_p10)  ;;  %vm2513_vm0 = vmmov (!%p1706_p10), 0  }
 0x102   : > { %s397_s24 = scalar_lea.vmem [#allocation16], %s2902_s30  ;;  %402 = sbr.rel (%p1706_p10) target bundleno = 758 (0x2f6), region = 80  ;;  %631 = vrot.lane.b32.xlu1 (!%p1706_p10), %v621_v0, %s2510_s27  ;;  %v2116_v1 = vld [vmem:[#allocation12] sm:$0xff] (!%p1706_p10)   ;;  %1808 = vmatprep.subr.bf16.mxu0 (!%p1706_p10), %v2512_v2  ;;  %v2117_v4 = vld [vmem:[#allocation12 + $0x8] sm:$0xff] (!%p1706_p10)   ;;  %v2915_v5 = vld [vmem:[#allocation9 + $0x8] sm:$0xff] (!%p1706_p10)  ;;  %vm643_vm1 = vcmask (!%p1706_p10), 130048  }
 0x103   : > { %s2511_s15 = smov (!%p1706_p10), 16   ;;  %1824 = vmatprep.mubr.msk.bf16.mxu0 (!%p1706_p10), %vm2513_vm0, %v2512_v2  ;;  %1809 = vmatpush3.bf16.msra.mxu0 (!%p1706_p10), %v2116_v1  ;;  %v2917_v6 = vld [vmem:[#allocation9] sm:$0xff] (!%p1706_p10)  ;;  %v2119_v8 = vld [vmem:[#allocation12 + $0x18] sm:$0xff] (!%p1706_p10)   ;;  %s2514_s13 = smov (!%p1706_p10), 48   ;;  %v2120_v9 = vld [vmem:[#allocation12 + $0x20] sm:$0xff] (!%p1706_p10)   ;;  %vm646_vm2 = vcmask (!%p1706_p10), 261120  }
 0x104   : > { %625 = vrot.lane.b32.xlu0 (!%p1706_p10), %v621_v0, %s2511_s15  ;;  %1828 = vmatprep.subr.bf16.mxu1 (!%p1706_p10), %v2512_v2  ;;  %v2118_v7 = vld [vmem:[#allocation12 + $0x10] sm:$0xff] (!%p1706_p10)   ;;  %v2121_v10 = vld [vmem:[#allocation12 + $0x28] sm:$0xff] (!%p1706_p10)   ;;  %v2123_v12 = vld [vmem:[#allocation12 + $0x38] sm:$0xff] (!%p1706_p10)   ;;  %vm649_vm3 = vcmask (!%p1706_p10), 392192   ;;  %s2515_s22 = smov (!%p1706_p10), 64   ;;  %vm749_vm4 = vcmask (!%p1706_p10), 523264  }
 0x105   : > { %1810 = vmatprep.subr.bf16.mxu0 (!%p1706_p10), %v2512_v2  ;;  %1844 = vmatprep.mubr.msk.bf16.mxu1 (!%p1706_p10), %vm2513_vm0, %v2512_v2  ;;  %v2122_v11 = vld [vmem:[#allocation12 + $0x30] sm:$0xff] (!%p1706_p10)   ;;  %v2125_v18 = vld [vmem:[#allocation13] sm:$0xff] (!%p1706_p10)   ;;  %v2126_v21 = vld [vmem:[#allocation13 + $0x8] sm:$0xff] (!%p1706_p10)   ;;  %vm752_vm5 = vcmask (!%p1706_p10), 654336   ;;  %vm755_vm6 = vcmask (!%p1706_p10), 785408   ;;  %vm758_vm7 = vcmask (!%p1706_p10), 916480  }
 0x106   : > { %633 = vrot.lane.b32.xlu1 (!%p1706_p10), %v622_v3, %s2510_s27  ;;  %v2124_v13 = vld [vmem:[%s343_s1] sm:$0xff] (!%p1706_p10)   ;;  %1829 = vmatpush3.bf16.msra.mxu1 (!%p1706_p10), %v2125_v18  ;;  %v2129_v36 = vld [vmem:[#allocation13 + $0x20] sm:$0xff] (!%p1706_p10)   ;;  %v2130_v43 = vld [vmem:[#allocation13 + $0x28] sm:$0xff] (!%p1706_p10)  }
 0x107   : > { %1811 = vmatpush3.bf16.msra.mxu0 (!%p1706_p10), %v2117_v4  ;;  %1830 = vmatprep.subr.bf16.mxu1 (!%p1706_p10), %v2512_v2  ;;  %v2127_v24 = vld [vmem:[#allocation13 + $0x10] sm:$0xff] (!%p1706_p10)   ;;  %v2128_v31 = vld [vmem:[#allocation13 + $0x18] sm:$0xff] (!%p1706_p10)  }
 0x108   : > { %627 = vrot.lane.b32.xlu0 (!%p1706_p10), %v622_v3, %s2511_s15  ;;  %1812 = vmatprep.subr.bf16.mxu0 (!%p1706_p10), %v2512_v2  ;;  %v2131_v44 = vld [vmem:[#allocation13 + $0x30] sm:$0xff] (!%p1706_p10)   ;;  %v2132_v45 = vld [vmem:[#allocation13 + $0x38] sm:$0xff] (!%p1706_p10)  }
 0x10a   : > { %658 = vrot.lane.b32.xlu1 %v2915_v5, %s2511_s15  ;;  %1831 = vmatpush3.bf16.msra.mxu1 %v2126_v21 }
 0x10b   : > { %1813 = vmatpush3.bf16.msra.mxu0 %v2118_v7  ;;  %1832 = vmatprep.subr.bf16.mxu1 %v2512_v2 }
 0x10c   : > { %656 = vrot.lane.b32.xlu0 %v2917_v6, %s2511_s15  ;;  %1814 = vmatprep.subr.bf16.mxu0 %v2512_v2 }
 0x10e   : > { %639 = vrot.lane.b32.xlu1 %v622_v3, %s2514_s13  ;;  %1833 = vmatpush3.bf16.msra.mxu1 %v2127_v24 }
 0x10f   : > { %1815 = vmatpush3.bf16.msra.mxu0 %v2119_v8  ;;  %1834 = vmatprep.subr.bf16.mxu1 %v2512_v2 }
 0x110   : > { %637 = vrot.lane.b32.xlu0 %v621_v0, %s2514_s13  ;;  %1816 = vmatprep.subr.bf16.mxu0 %v2512_v2 }
 0x112   : > { %664 = vrot.lane.b32.xlu1 %v2915_v5, %s2510_s27  ;;  %1835 = vmatpush3.bf16.msra.mxu1 %v2128_v31 }
 0x113   : > { %1817 = vmatpush3.bf16.msra.mxu0 %v2120_v9  ;;  %1836 = vmatprep.subr.bf16.mxu1 %v2512_v2 }
 0x114   : > { %662 = vrot.lane.b32.xlu0 %v2917_v6, %s2510_s27  ;;  %1818 = vmatprep.subr.bf16.mxu0 %v2512_v2 }
 0x116   : > { %670 = vrot.lane.b32.xlu1 %v2915_v5, %s2514_s13  ;;  %1837 = vmatpush3.bf16.msra.mxu1 %v2129_v36 }
 0x117   : > { %1819 = vmatpush3.bf16.msra.mxu0 %v2121_v10  ;;  %1838 = vmatprep.subr.bf16.mxu1 %v2512_v2 }
 0x118   : > { %668 = vrot.lane.b32.xlu0 %v2917_v6, %s2514_s13  ;;  %1820 = vmatprep.subr.bf16.mxu0 %v2512_v2 }
 0x11a   : > { %1839 = vmatpush3.bf16.msra.mxu1 %v2130_v43 }
 0x11b   : > { %1821 = vmatpush3.bf16.msra.mxu0 %v2122_v11  ;;  %1840 = vmatprep.subr.bf16.mxu1 %v2512_v2 }
 0x11c   : > { %1822 = vmatprep.subr.bf16.mxu0 %v2512_v2 }
 0x11e   : > { %1841 = vmatpush3.bf16.msra.mxu1 %v2131_v44 }
 0x11f   : > { %1823 = vmatpush3.bf16.msra.mxu0 %v2123_v12  ;;  %1842 = vmatprep.subr.bf16.mxu1 %v2512_v2 }
 0x122   : > { %1825 = vmatmul.mubr.bf16.vlgmr.msra.gmra.mrb[0].mxu0 %v2124_v13  ;;  %1843 = vmatpush3.bf16.msra.mxu1 %v2132_v45 }
 0x125   : > { %1845 = vmatmul.mubr.bf16.vlgmr.msra.gmra.mrb[0].mxu1 %v2124_v13 }
 0x174   : > { %v632_v14 = vpop.permute.xlu1 %631 }
 0x176   : > { %v626_v15 = vpop.permute.xlu0 %625 }
 0x177   : > { %v644_v22 = vsel %vm643_vm1, %v621_v0, %v626_v15 }
 0x178   : > { %v634_v16 = vpop.permute.xlu1 %633  ;;  %v647_v28 = vsel %vm646_vm2, %v644_v22, %v632_v14 }
 0x17a   : > { %v628_v17 = vpop.permute.xlu0 %627 }
 0x17b   : > { %v645_v23 = vsel %vm643_vm1, %v622_v3, %v628_v17 }
 0x17c   : > { %v659_v19 = vpop.permute.xlu1 %658  ;;  %v648_v27 = vsel %vm646_vm2, %v645_v23, %v634_v16 }
 0x17d   : > { %v675_v34 = vsel %vm643_vm1, %v2915_v5, %v659_v19 }
 0x17e   : > { %v657_v20 = vpop.permute.xlu0 %656 }
 0x17f   : > { %v674_v35 = vsel %vm643_vm1, %v2917_v6, %v657_v20 }
 0x180   : > { %v640_v25 = vpop.permute.xlu1 %639 }
 0x181   : > { %v651_v29 = vsel %vm649_vm3, %v648_v27, %v640_v25 }
 0x182   : > { %v638_v26 = vpop.permute.xlu0 %637  ;;  %709 = vrot.lane.b32.xlu1 %v651_v29, %s2515_s22 }
 0x183   : > { %v650_v30 = vsel %vm649_vm3, %v647_v28, %v638_v26 }
 0x184   : > { %707 = vrot.lane.b32.xlu0 %v650_v30, %s2515_s22  ;;  %v665_v32 = vpop.permute.xlu1 %664 }
 0x185   : > { %v677_v37 = vsel %vm646_vm2, %v675_v34, %v665_v32 }
 0x186   : > { %v663_v33 = vpop.permute.xlu0 %662 }
 0x187   : > { %v676_v38 = vsel %vm646_vm2, %v674_v35, %v663_v33 }
 0x188   : > { %v671_v39 = vpop.permute.xlu1 %670 }
 0x189   : > { %v679_v41 = vsel %vm649_vm3, %v677_v37, %v671_v39 }
 0x18a   : > { %v669_v40 = vpop.permute.xlu0 %668  ;;  %686 = vrot.lane.b32.xlu1 %v679_v41, %s2515_s22 }
 0x18b   : > { %v678_v42 = vsel %vm649_vm3, %v676_v38, %v669_v40 }
 0x18c   : > { %684 = vrot.lane.b32.xlu0 %v678_v42, %s2515_s22 }
 0x1f4   : > { %v710_v50 = vpop.permute.xlu1 %709 }
 0x1f5   : > { %v509_v47 = vpop.f32.mrb[0].mxu0 }
 0x1f6   : > { %v708_v46 = vpop.permute.xlu0 %707  ;;  %v1826_v48 = vpop.f32.mrb[1].mxu0  ;;  %v703_v59 = vmul.f32 %v678_v42, %v509_v47  ;;  %v680_v4 = vmul.f32 %v650_v30, %v509_v47 }
 0x1f7   : > { %v713_v49 = vmul.f32 %v708_v46, %v509_v47  ;;  %v512_v51 = vpop.f32.mrb[2].mxu0 }
 0x1f8   : > { %v1827_v52 = vpop.f32.mrb[3].mxu0  ;;  %v714_v53 = vmul.f32 %v710_v50, %v512_v51  ;;  %v704_v60 = vmul.f32 %v679_v41, %v512_v51  ;;  %v614_v62 = vpop.f32.mrb[0].mxu1  ;;  %v681_v5 = vmul.f32 %v651_v29, %v512_v51 }
 0x1f9   : > { %717 = vrot.lane.b32.xlu0 %v713_v49, %s2515_s22  ;;  %v1846_v1 = vpop.f32.mrb[1].mxu1 }
 0x1fa   : > { %719 = vrot.lane.b32.xlu1 %v714_v53, %s2515_s22  ;;  %v617_v2 = vpop.f32.mrb[2].mxu1 }
 0x1fb   : > { %v763_v6 = vpack.c.bf16 %v617_v2, %v614_v62  ;;  %v1847_v7 = vpop.f32.mrb[3].mxu1 }
 0x1fc   : > { %v687_v54 = vpop.permute.xlu1 %686 }
 0x1fd   : > { %v691_v56 = vmul.f32 %v687_v54, %v512_v51  ;;  %764 = vst [vmem:[#allocation3] sm:$0xff] %v763_v6 }
 0x1fe   : > { %v685_v55 = vpop.permute.xlu0 %684 }
 0x1ff   : > { %v690_v57 = vmul.f32 %v685_v55, %v509_v47  ;;  %696 = vrot.lane.b32.xlu1 %v691_v56, %s2515_s22 }
 0x201   : > { %694 = vrot.lane.b32.xlu0 %v690_v57, %s2515_s22 }
 0x26b   : > { %v718_v58 = vpop.permute.xlu0 %717 }
 0x26c   : > { %v720_v61 = vpop.permute.xlu1 %719  ;;  %v723_v63 = vadd.f32 %v718_v58, %v703_v59 }
 0x26d   : > { %v724_v0 = vadd.f32 %v720_v61, %v704_v60 }
 0x26f   : > { %v725_v3 = vpack.c.bf16 %v724_v0, %v723_v63 }
 0x271   : > { %v697_v9 = vpop.permute.xlu1 %696  ;;  %727 = vrot.lane.b32.xlu0 %v725_v3, %s2511_s15 }
 0x272   : > { %v701_v11 = vsub.f32 %v681_v5, %v697_v9 }
 0x273   : > { %v695_v8 = vpop.permute.xlu0 %694 }
 0x274   : > { %v700_v10 = vsub.f32 %v680_v4, %v695_v8 }
 0x275   : > { %732 = vrot.lane.b32.xlu0 %v725_v3, %s2510_s27 }
 0x276   : > { %v702_v12 = vpack.c.bf16 %v701_v11, %v700_v10 }
 0x278   : > { %730 = vrot.lane.b32.xlu1 %v702_v12, %s2511_s15 }
 0x279   : > { %736 = vrot.lane.b32.xlu0 %v725_v3, %s2514_s13 }
 0x27c   : > { %734 = vrot.lane.b32.xlu1 %v702_v12, %s2510_s27 }
 0x27d   : > { %740 = vrot.lane.b32.xlu0 %v725_v3, %s2515_s22 }
 0x280   : > { %738 = vrot.lane.b32.xlu1 %v702_v12, %s2514_s13 }
 0x2e3   : > { %v728_v13 = vpop.permute.xlu0 %727 }
 0x2e4   : > { %v744_v14 = vsel %vm643_vm1, %v702_v12, %v728_v13 }
 0x2e7   : > { %v733_v15 = vpop.permute.xlu0 %732 }
 0x2ea   : > { %v731_v16 = vpop.permute.xlu1 %730 }
 0x2eb   : > { %v746_v17 = vsel %vm646_vm2, %v744_v14, %v731_v16  ;;  %v737_v18 = vpop.permute.xlu0 %736 }
 0x2ec   : > { %v748_v20 = vsel %vm649_vm3, %v746_v17, %v733_v15 }
 0x2ee   : > { %v735_v19 = vpop.permute.xlu1 %734 }
 0x2ef   : > { %v751_v21 = vsel %vm749_vm4, %v748_v20, %v735_v19  ;;  %v741_v24 = vpop.permute.xlu0 %740 }
 0x2f0   : > { %v754_v23 = vsel %vm752_vm5, %v751_v21, %v737_v18 }
 0x2f2   : > { %v739_v22 = vpop.permute.xlu1 %738 }
 0x2f3   : > { %v757_v25 = vsel %vm755_vm6, %v754_v23, %v739_v22 }
 0x2f4   : > { %v760_v26 = vsel %vm758_vm7, %v757_v25, %v741_v24 }
 0x2f5   : > { %762 = vst [vmem:[#allocation2] sm:$0xff] %v760_v26 }
 0x2f6 PF: > { %v2133_v27 = vld [vmem:[#allocation10] sm:$0xff]   ;;  %s3254_s0 = sld [smem:[#allocation24_spill]]  ;;  %v2516_v28 = vmov 0.0   ;;  %v2134_v29 = vld [vmem:[#allocation10 + $0x8] sm:$0xff]   ;;  %s2517_s3 = smov 16   ;;  %vm2518_vm8 = vmmov 0  }
 0x2f7   : > { %1848 = vmatprep.subr.bf16.mxu0 %v2516_v28  ;;  %1868 = vmatprep.subr.bf16.mxu1 %v2516_v28  ;;  %v2135_v32 = vld [vmem:[#allocation10 + $0x10] sm:$0xff]   ;;  %s2519_s14 = smov 32   ;;  %s2520_s27 = smov 48   ;;  %v2136_v33 = vld [vmem:[#allocation10 + $0x18] sm:$0xff]   ;;  %v2137_v34 = vld [vmem:[#allocation10 + $0x20] sm:$0xff]   ;;  %vm887_vm9 = vcmask 130048  }
 0x2f8   : > { %1849 = vmatpush3.bf16.msra.mxu0 %v2133_v27  ;;  %1864 = vmatprep.mubr.msk.bf16.mxu0 %vm2518_vm8, %v2516_v28  ;;  %v2138_v35 = vld [vmem:[#allocation10 + $0x28] sm:$0xff]   ;;  %v2139_v36 = vld [vmem:[#allocation10 + $0x30] sm:$0xff]   ;;  %v2140_v37 = vld [vmem:[#allocation10 + $0x38] sm:$0xff]   ;;  %vm889_vm10 = vcmask 261120   ;;  %vm891_vm11 = vcmask 392192   ;;  %s2521_s8 = smov 64  }
 0x2f9   : > { %1850 = vmatprep.subr.bf16.mxu0 %v2516_v28  ;;  %1870 = vmatprep.mubr.msk.bf16.mxu1 %vm2518_vm8, %v2516_v28  ;;  %vm955_vm12 = vcmask 523264   ;;  %vm958_vm13 = vcmask 654336   ;;  %vm961_vm14 = vcmask 785408   ;;  %vm964_vm15 = vcmask 916480   ;;  %p3258_p6 = scmp.ne.s32.totalorder %s3243_s12, 0 }
 0x2fc   : > { %s2982_s18 = sshll.u32 %s3254_s0, 3  ;;  %1851 = vmatpush3.bf16.msra.mxu0 %v2134_v29  ;;  %v3020_v59 = vld [vmem:[#allocation2] sm:$0xff] }
 0x2fd   : > { %s875_s7 = scalar_lea.vmem [#allocation7], %s2982_s18  ;;  %s893_s16 = scalar_lea.vmem [#allocation9], %s2982_s18  ;;  %1852 = vmatprep.subr.bf16.mxu0 %v2516_v28  ;;  %v972_v60 = vsel %vm889_vm10, %v3020_v59, 0 }
 0x2fe   : > { %v876_v30 = vld [vmem:[%s875_s7] sm:$0xff]  ;;  %s766_s15 = sshra.s32 %s2982_s18, 3  ;;  %1869 = vmatpush3.bf16.xpose.msra.mxu1 %v972_v60  ;;  %s3255_s18 = sld [smem:[#allocation25_spill]] }
 0x2ff   : > { %v894_v31 = vld [vmem:[%s893_s16] sm:$0xff]  ;;  %878 = vrot.lane.b32.xlu0 %v876_v30, %s2517_s3  ;;  %s1725_s13 = sshll.u32 %s766_s15, 2  ;;  %1874 = vmatprep.subr.bf16.mxu1 %v2516_v28 }
 0x300   : > { %896 = vrot.lane.b32.xlu1 %v894_v31, %s2517_s3  ;;  %1853 = vmatpush3.bf16.msra.mxu0 %v2135_v32  ;;  %s769_s22 = scalar_lea.vmem %s343_s1, %s1725_s13 [#allocation4]  ;;  %s2522_s1 = smov 96  }
 0x301   : > { %1854 = vmatprep.subr.bf16.mxu0 %v2516_v28  ;;  %v770_v38 = vld [vmem:[%s769_s22] sm:$0xf]  ;;  %s3257_s22 = sld [smem:[#allocation32_spill]] }
 0x303   : > { %881 = vrot.lane.b32.xlu0 %v876_v30, %s2519_s14 }
 0x304   : > { %884 = vrot.lane.b32.xlu1 %v876_v30, %s2520_s27  ;;  %1855 = vmatpush3.bf16.msra.mxu0 %v2136_v33  ;;  %s1751_s16 = sshll.u32 %s3255_s18, 1  ;;  %s2523_s18 = smov [#allocation16]  }
 0x305   : > { %1856 = vmatprep.subr.bf16.mxu0 %v2516_v28 }
 0x307   : > { %899 = vrot.lane.b32.xlu0 %v894_v31, %s2519_s14 }
 0x308   : > { %902 = vrot.lane.b32.xlu1 %v894_v31, %s2520_s27  ;;  %1857 = vmatpush3.bf16.msra.mxu0 %v2137_v34 }
 0x309   : > { %1858 = vmatprep.subr.bf16.mxu0 %v2516_v28 }
 0x30c   : > { %1859 = vmatpush3.bf16.msra.mxu0 %v2138_v35 }
 0x30d   : > { %1860 = vmatprep.subr.bf16.mxu0 %v2516_v28 }
 0x310   : > { %1861 = vmatpush3.bf16.msra.mxu0 %v2139_v36 }
 0x311   : > { %1862 = vmatprep.subr.bf16.mxu0 %v2516_v28 }
 0x314   : > { %1863 = vmatpush3.bf16.msra.mxu0 %v2140_v37 }
 0x315   : > { %1916 = vmatprep.subr.bf16.mxu0 %v2516_v28 }
 0x317   : > { %1865 = vmatmul.mubr.bf16.vlgmr.msra.gmra.mrb[0].mxu0 %v770_v38 }
 0x318   : > { %1932 = vmatprep.mubr.msk.bf16.mxu0 %vm2518_vm8, %v2516_v28 }
 0x371   : > { %v879_v39 = vpop.permute.xlu0 %878 }
 0x372   : > { %v897_v40 = vpop.permute.xlu1 %896  ;;  %v888_v41 = vsel %vm887_vm9, %v876_v30, %v879_v39  ;;  %v3047_v30 = vld [vmem:[#allocation3] sm:$0xff] }
 0x373   : > { %v905_v45 = vsel %vm887_vm9, %v894_v31, %v897_v40 }
 0x375   : > { %v882_v42 = vpop.permute.xlu0 %881 }
 0x376   : > { %v885_v43 = vpop.permute.xlu1 %884  ;;  %v890_v44 = vsel %vm889_vm10, %v888_v41, %v882_v42 }
 0x377   : > { %v892_v46 = vsel %vm891_vm11, %v890_v44, %v885_v43 }
 0x378   : > { %922 = vrot.lane.b32.xlu0 %v892_v46, %s2521_s8 }
 0x379   : > { %v900_v47 = vpop.permute.xlu0 %899 }
 0x37a   : > { %v903_v48 = vpop.permute.xlu1 %902  ;;  %v906_v49 = vsel %vm889_vm10, %v905_v45, %v900_v47 }
 0x37b   : > { %v907_v50 = vsel %vm891_vm11, %v906_v49, %v903_v48 }
 0x37c   : > { %910 = vrot.lane.b32.xlu1 %v907_v50, %s2521_s8 }
 0x3ea   : > { %v923_v51 = vpop.permute.xlu0 %922  ;;  %v869_v53 = vpop.f32.mrb[0].mxu0 }
 0x3eb   : > { %v1866_v54 = vpop.f32.mrb[1].mxu0  ;;  %v925_v55 = vmul.f32 %v923_v51, %v869_v53  ;;  %v920_v61 = vmul.f32 %v907_v50, %v869_v53  ;;  %v908_v62 = vmul.f32 %v892_v46, %v869_v53 }
 0x3ec   : > { %v872_v57 = vpop.f32.mrb[2].mxu0 }
 0x3ed   : > { %927 = vrot.lane.b32.xlu0 %v925_v55, %s2521_s8  ;;  %v1867_v58 = vpop.f32.mrb[3].mxu0 }
 0x3ee   : > { %v911_v52 = vpop.permute.xlu1 %910 }
 0x3ef   : > { %v913_v56 = vmul.f32 %v911_v52, %v869_v53 }
 0x3f1   : > { %915 = vrot.lane.b32.xlu1 %v913_v56, %s2521_s8 }
 0x45f   : > { %v928_v63 = vpop.permute.xlu0 %927 }
 0x460   : > { %v930_v1 = vadd.f32 %v928_v63, %v920_v61 }
 0x462   : > { %v931_v3 = vpack.c.bf16 %v930_v1, %v930_v1 }
 0x463   : > { %v916_v0 = vpop.permute.xlu1 %915 }
 0x464   : > { %v918_v2 = vsub.f32 %v908_v62, %v916_v0  ;;  %933 = vrot.lane.b32.xlu0 %v931_v3, %s2517_s3 }
 0x466   : > { %v919_v4 = vpack.c.bf16 %v918_v2, %v918_v2 }
 0x468   : > { %936 = vrot.lane.b32.xlu1 %v919_v4, %s2517_s3  ;;  %938 = vrot.lane.b32.xlu0 %v931_v3, %s2519_s14  ;;  %s1534_s3 = sadd.s32 %s3254_s0, %s1751_s16  ;;  %s1523_s0 = scalar_lea.sflag [#allocation6], %s395_s23 }
 0x469   : > { %s2367_s16 = sshll.u32 %s2523_s18, 4  ;;  %s2368_s16 = int_to_ptr.vmem [resolvable:$false] %s2367_s16 }
 0x46c   : > { %940 = vrot.lane.b32.xlu1 %v919_v4, %s2519_s14  ;;  %942 = vrot.lane.b32.xlu0 %v931_v3, %s2520_s27 }
 0x470   : > { %944 = vrot.lane.b32.xlu1 %v919_v4, %s2520_s27  ;;  %946 = vrot.lane.b32.xlu0 %v931_v3, %s2521_s8  ;;  %s1538_s27 = sshll.u32 %s397_s24, 4  ;;  %s3126_s27 = int_to_ptr.vmem [resolvable:$true] %s1538_s27 }
 0x471   : > { %p2370_p5 = scmp.lt.s32.totalorder %s3126_s27, %s2368_s16 }
 0x4d6   : > { %v934_v5 = vpop.permute.xlu0 %933 }
 0x4d7   : > { %v950_v7 = vsel %vm887_vm9, %v919_v4, %v934_v5 }
 0x4da   : > { %v937_v6 = vpop.permute.xlu1 %936  ;;  %v939_v9 = vpop.permute.xlu0 %938 }
 0x4db   : > { %v952_v8 = vsel %vm889_vm10, %v950_v7, %v937_v6 }
 0x4dc   : > { %v954_v11 = vsel %vm891_vm11, %v952_v8, %v939_v9 }
 0x4de   : > { %v941_v10 = vpop.permute.xlu1 %940  ;;  %v943_v13 = vpop.permute.xlu0 %942 }
 0x4df   : > { %v957_v12 = vsel %vm955_vm12, %v954_v11, %v941_v10 }
 0x4e0   : > { %v960_v14 = vsel %vm958_vm13, %v957_v12, %v943_v13 }
 0x4e2   : > { %v945_v15 = vpop.permute.xlu1 %944  ;;  %v947_v17 = vpop.permute.xlu0 %946 }
 0x4e3   : > { %v963_v16 = vsel %vm961_vm14, %v960_v14, %v945_v15 }
 0x4e4   : > { %v3037_v18 = vsel %vm964_vm15, %v963_v16, %v947_v17 }
 0x4e5   : > { %1871 = vmatmul.mubr.msk.bf16.vlgmr.msra.gmra.mrb[0].mxu1 %vm889_vm10, %v3037_v18 }
 0x4e6   : > { %1876 = vmatprep.mubr.msk.bf16.mxu1 %vm2518_vm8, %v2516_v28  ;;  %1875 = vmatpush3.bf16.msra.mxu1 %v3047_v30 }
 0x4e7   : > { %1880 = vmatprep.subr.bf16.mxu1 %v2516_v28 }
 0x5b8   : > { %v1008_v19 = vpop.f32.mrb[0].mxu1 }
 0x5b9   : > { %v1872_v20 = vpop.f32.mrb[1].mxu1  ;;  %v1014_v21 = vsel %vm887_vm9, %v1008_v19, -inf }
 0x5ba   : > { %1015 = vmax.xlane.f32.xlu1 %v1014_v21  ;;  %v1011_v22 = vpop.f32.mrb[2].mxu1 }
 0x5bb   : > { %v1873_v23 = vpop.f32.mrb[3].mxu1 }
 0x5cb   : > { %1071 = vrot.lane.b32.xlu1 %v3037_v18, %s2522_s1 }
 0x647   : > { %v1016_v24 = vpop.xlane.xlu1 %1015 }
 0x648   : > { %v1017_v25 = vsub.f32 %v1008_v19, %v1016_v24 }
 0x64a   : > { %v1018_v26 = vmul.f32 1.442695, %v1017_v25 }
 0x64b   : > { %v1072_v37 = vpop.permute.xlu1 %1071 }
 0x64c   : > { %2149 = vpow2.f32 %v1018_v26 }
 0x656   : > { %v2150_v27 = vpop.eup %2149 }
 0x657   : > { %v1020_v29 = vsel %vm887_vm9, %v2150_v27, 0.0 }
 0x658   : > { %1021 = vadd.xlane.f32.xlu0 %v1020_v29 }
 0x66e   : > { %1074 = vrot.lane.b32.xlu0 %v3020_v59, %s2522_s1 }
 0x6e5   : > { %v1022_v31 = vpop.xlane.xlu0 %1021 }
 0x6e6   : > { %2151 = vrcp.f32 %v1022_v31 }
 0x6e9   : > { %v1075_v33 = vpop.permute.xlu0 %1074 }
 0x6ea   : > { %v1080_v35 = vsel %vm889_vm10, %v1075_v33, 0 }
 0x6f0   : > { %v2152_v32 = vpop.eup %2151 }
 0x6f1   : > { %v1024_v34 = vmul.f32 %v2152_v32, %v2150_v27 }
 0x6f3   : > { %v1025_v36 = vpack.c.bf16 %v1024_v34, %v1024_v34 }
 0x6f5   : > { %1877 = vmatmul.mubr.msk.bf16.vlgmr.msra.gmra.mrb[4].mxu1 %vm887_vm9, %v1025_v36 }
 0x6f6   : > { %1881 = vmatpush3.bf16.xpose.msra.mxu1 %v1080_v35  ;;  %1882 = vmatprep.mubr.msk.bf16.mxu1 %vm2518_vm8, %v2516_v28 }
 0x6f7   : > { %1886 = vmatprep.subr.bf16.mxu1 %v2516_v28 }
 0x6fd   : > { %1883 = vmatmul.mubr.msk.bf16.vlgmr.msra.gmra.mrb[8].mxu1 %vm889_vm10, %v1072_v37 }
 0x6fe   : > { %1888 = vmatprep.mubr.msk.bf16.mxu1 %vm2518_vm8, %v2516_v28 }
 0x7c8   : > { %v3061_v38 = vpop.f32.mrb[4].mxu1 }
 0x7c9   : > { %v1878_v39 = vpop.f32.mrb[5].mxu1 }
 0x7ca   : > { %v1066_v40 = vpop.f32.mrb[6].mxu1 }
 0x7cb   : > { %v1879_v41 = vpop.f32.mrb[7].mxu1 }
 0x7d0   : > { %v1116_v42 = vpop.f32.mrb[8].mxu1 }
 0x7d1   : > { %v1884_v43 = vpop.f32.mrb[9].mxu1  ;;  %v1122_v44 = vsel %vm887_vm9, %v1116_v42, -inf }
 0x7d2   : > { %1123 = vmax.xlane.f32.xlu1 %v1122_v44  ;;  %v1119_v45 = vpop.f32.mrb[10].mxu1  ;;  %v2142_v43 = vld [vmem:[#allocation15 + $0x8] sm:$0xff]   ;;  %v2143_v44 = vld [vmem:[#allocation15 + $0x10] sm:$0xff]  }
 0x7d3   : > { %v1885_v46 = vpop.f32.mrb[11].mxu1  ;;  %v2145_v45 = vld [vmem:[#allocation15 + $0x20] sm:$0xff]  }
 0x7d4   : > { %v2146_v46 = vld [vmem:[#allocation15 + $0x28] sm:$0xff]  }
 0x7e3   : > { %1184 = vrot.lane.b32.xlu1 %v3020_v59, %s2521_s8 }
 0x7e7   : > { %1182 = vrot.lane.b32.xlu1 %v3037_v18, %s2521_s8 }
 0x85f   : > { %v1124_v47 = vpop.xlane.xlu1 %1123 }
 0x860   : > { %v1125_v48 = vsub.f32 %v1116_v42, %v1124_v47  ;;  %v2141_v42 = vld [vmem:[#allocation15] sm:$0xff]   ;;  %v2147_v47 = vld [vmem:[#allocation15 + $0x30] sm:$0xff]  }
 0x861   : > { %1917 = vmatpush3.bf16.msra.mxu0 %v2141_v42 }
 0x862   : > { %v1126_v49 = vmul.f32 1.442695, %v1125_v48  ;;  %1918 = vmatprep.subr.bf16.mxu0 %v2516_v28  ;;  %v2148_v48 = vld [vmem:[#allocation15 + $0x38] sm:$0xff]  }
 0x863   : > { %v1185_v56 = vpop.permute.xlu1 %1184 }
 0x864   : > { %2153 = vpow2.f32 %v1126_v49  ;;  %v1190_v57 = vsel %vm889_vm10, %v1185_v56, 0 }
 0x865   : > { %1919 = vmatpush3.bf16.msra.mxu0 %v2142_v43 }
 0x866   : > { %1920 = vmatprep.subr.bf16.mxu0 %v2516_v28 }
 0x867   : > { %v1183_v60 = vpop.permute.xlu1 %1182 }
 0x869   : > { %1921 = vmatpush3.bf16.msra.mxu0 %v2143_v44 }
 0x86a   : > { %1922 = vmatprep.subr.bf16.mxu0 %v2516_v28 }
 0x86e   : > { %v2154_v50 = vpop.eup %2153 }
 0x86f   : > { %v1128_v51 = vsel %vm887_vm9, %v2154_v50, 0.0 }
 0x870   : > { %1129 = vadd.xlane.f32.xlu0 %v1128_v51 }
 0x886   : > { %1135 = vrot.lane.b32.xlu0 %v3047_v30, %s2522_s1 }
 0x8fd   : > { %v1130_v52 = vpop.xlane.xlu0 %1129 }
 0x8fe   : > { %2155 = vrcp.f32 %v1130_v52 }
 0x901   : > { %v1136_v53 = vpop.permute.xlu0 %1135 }
 0x902   : > { %1887 = vmatpush3.bf16.msra.mxu1 %v1136_v53 }
 0x903   : > { %1892 = vmatprep.subr.bf16.mxu1 %v2516_v28 }
 0x908   : > { %v2156_v54 = vpop.eup %2155 }
 0x909   : > { %v1132_v55 = vmul.f32 %v2156_v54, %v2154_v50 }
 0x90b   : > { %v1133_v58 = vpack.c.bf16 %v1132_v55, %v1132_v55  ;;  %v1069_v55 = vpack.c.bf16 %v3061_v38, %v3061_v38 }
 0x90d   : > { %1889 = vmatmul.mubr.msk.bf16.vlgmr.msra.gmra.mrb[12].mxu1 %vm887_vm9, %v1133_v58 }
 0x90e   : > { %1893 = vmatpush3.bf16.xpose.msra.mxu1 %v1190_v57  ;;  %1894 = vmatprep.mubr.msk.bf16.mxu1 %vm2518_vm8, %v2516_v28 }
 0x90f   : > { %1898 = vmatprep.subr.bf16.mxu1 %v2516_v28 }
 0x915   : > { %1895 = vmatmul.mubr.msk.bf16.vlgmr.msra.gmra.mrb[16].mxu1 %vm889_vm10, %v1183_v60 }
 0x916   : > { %1900 = vmatprep.mubr.msk.bf16.mxu1 %vm2518_vm8, %v2516_v28 }
 0x9e0   : > { %v1175_v61 = vpop.f32.mrb[12].mxu1 }
 0x9e1   : > { %v1890_v62 = vpop.f32.mrb[13].mxu1  ;;  %v1181_v27 = vpack.c.bf16 %v1175_v61, %v1175_v61 }
 0x9e2   : > { %v1178_v63 = vpop.f32.mrb[14].mxu1 }
 0x9e3   : > { %v1891_v0 = vpop.f32.mrb[15].mxu1 }
 0x9e8   : > { %v1226_v1 = vpop.f32.mrb[16].mxu1 }
 0x9e9   : > { %v1896_v2 = vpop.f32.mrb[17].mxu1  ;;  %v1232_v3 = vsel %vm887_vm9, %v1226_v1, -inf }
 0x9ea   : > { %1233 = vmax.xlane.f32.xlu0 %v1232_v3  ;;  %v1229_v4 = vpop.f32.mrb[18].mxu1 }
 0x9eb   : > { %v1897_v5 = vpop.f32.mrb[19].mxu1 }
 0xa00   : > { %1244 = vrot.lane.b32.xlu0 %v3047_v30, %s2521_s8 }
 0xa04   : > { %1291 = vrot.lane.b32.xlu0 %v3037_v18, %s2519_s14 }
 0xa77   : > { %v1234_v6 = vpop.xlane.xlu0 %1233 }
 0xa78   : > { %v1235_v7 = vsub.f32 %v1226_v1, %v1234_v6 }
 0xa7a   : > { %v1236_v8 = vmul.f32 1.442695, %v1235_v7 }
 0xa7b   : > { %v1245_v9 = vpop.permute.xlu0 %1244 }
 0xa7c   : > { %2157 = vpow2.f32 %v1236_v8  ;;  %1899 = vmatpush3.bf16.msra.mxu1 %v1245_v9 }
 0xa7d   : > { %1904 = vmatprep.subr.bf16.mxu1 %v2516_v28 }
 0xa7f   : > { %v1292_v18 = vpop.permute.xlu0 %1291 }
 0xa86   : > { %v2158_v10 = vpop.eup %2157 }
 0xa87   : > { %v1238_v11 = vsel %vm887_vm9, %v2158_v10, 0.0 }
 0xa88   : > { %1239 = vadd.xlane.f32.xlu1 %v1238_v11 }
 0xa99   : > { %1293 = vrot.lane.b32.xlu1 %v3020_v59, %s2519_s14 }
 0xb15   : > { %v1240_v12 = vpop.xlane.xlu1 %1239 }
 0xb16   : > { %2159 = vrcp.f32 %v1240_v12 }
 0xb19   : > { %v1294_v14 = vpop.permute.xlu1 %1293 }
 0xb1a   : > { %v1299_v16 = vsel %vm889_vm10, %v1294_v14, 0 }
 0xb20   : > { %v2160_v13 = vpop.eup %2159 }
 0xb21   : > { %v1242_v15 = vmul.f32 %v2160_v13, %v2158_v10 }
 0xb23   : > { %v1243_v17 = vpack.c.bf16 %v1242_v15, %v1242_v15 }
 0xb25   : > { %1901 = vmatmul.mubr.msk.bf16.vlgmr.msra.gmra.mrb[20].mxu1 %vm887_vm9, %v1243_v17 }
 0xb26   : > { %1905 = vmatpush3.bf16.xpose.msra.mxu1 %v1299_v16  ;;  %1906 = vmatprep.mubr.msk.bf16.mxu1 %vm2518_vm8, %v2516_v28 }
 0xb27   : > { %1910 = vmatprep.subr.bf16.mxu1 %v2516_v28 }
 0xb2d   : > { %1907 = vmatmul.mubr.msk.bf16.vlgmr.msra.gmra.mrb[24].mxu1 %vm889_vm10, %v1292_v18 }
 0xb2e   : > { %1912 = vmatprep.mubr.msk.bf16.mxu1 %vm2518_vm8, %v2516_v28 }
 0xbf8   : > { %v1284_v59 = vpop.f32.mrb[20].mxu1 }
 0xbf9   : > { %v1902_v19 = vpop.f32.mrb[21].mxu1  ;;  %v1290_v29 = vpack.c.bf16 %v1284_v59, %v1284_v59 }
 0xbfa   : > { %v1287_v20 = vpop.f32.mrb[22].mxu1 }
 0xbfb   : > { %v1903_v21 = vpop.f32.mrb[23].mxu1 }
 0xc00   : > { %v1335_v22 = vpop.f32.mrb[24].mxu1 }
 0xc01   : > { %v1908_v23 = vpop.f32.mrb[25].mxu1  ;;  %v1341_v24 = vsel %vm887_vm9, %v1335_v22, -inf }
 0xc02   : > { %1342 = vmax.xlane.f32.xlu1 %v1341_v24  ;;  %v1338_v25 = vpop.f32.mrb[26].mxu1 }
 0xc03   : > { %v1909_v26 = vpop.f32.mrb[27].mxu1 }
 0xc13   : > { %1401 = vrot.lane.b32.xlu1 %v1181_v27, %s2519_s14 }
 0xc17   : > { %1404 = vrot.lane.b32.xlu1 %v1290_v29, %s2521_s8 }
 0xc8f   : > { %v1343_v31 = vpop.xlane.xlu1 %1342 }
 0xc90   : > { %v1344_v32 = vsub.f32 %v1335_v22, %v1343_v31 }
 0xc92   : > { %v1345_v33 = vmul.f32 1.442695, %v1344_v32 }
 0xc93   : > { %v1402_v54 = vpop.permute.xlu1 %1401 }
 0xc94   : > { %2161 = vpow2.f32 %v1345_v33 }
 0xc97   : > { %v1405_v56 = vpop.permute.xlu1 %1404 }
 0xc9e   : > { %v2162_v34 = vpop.eup %2161 }
 0xc9f   : > { %v1347_v35 = vsel %vm887_vm9, %v2162_v34, 0.0 }
 0xca0   : > { %1348 = vadd.xlane.f32.xlu0 %v1347_v35 }
 0xcb6   : > { %1353 = vrot.lane.b32.xlu0 %v3047_v30, %s2519_s14  ;;  %v2144_v30 = vld [vmem:[#allocation15 + $0x18] sm:$0xff]   ;;  %s1752_s14 = sshll.u32 %s1534_s3, 7  ;;  %s2369_s3 = scalar_lea.vmem %s2368_s16, 256 }
 0xcb7   : > { %1923 = vmatpush3.bf16.msra.mxu0 %v2144_v30  ;;  %s3124_s8 = scalar_lea.hbm %s3257_s22, %s1752_s14 }
 0xcb8   : > { %1924 = vmatprep.subr.bf16.mxu0 %v2516_v28 }
 0xcbb   : > { %1925 = vmatpush3.bf16.msra.mxu0 %v2145_v45 }
 0xcbc   : > { %1926 = vmatprep.subr.bf16.mxu0 %v2516_v28 }
 0xcbf   : > { %1927 = vmatpush3.bf16.msra.mxu0 %v2146_v46 }
 0xcc0   : > { %1928 = vmatprep.subr.bf16.mxu0 %v2516_v28 }
 0xcc3   : > { %1929 = vmatpush3.bf16.msra.mxu0 %v2147_v47 }
 0xcc4   : > { %1930 = vmatprep.subr.bf16.mxu0 %v2516_v28  ;;  %v1411_v28 = vsel %vm889_vm10, %v1069_v55, %v1402_v54 }
 0xcc5   : > { %v1413_v57 = vsel %vm955_vm12, %v1411_v28, %v1405_v56 }
 0xcc7   : > { %1931 = vmatpush3.bf16.msra.mxu0 %v2148_v48 }
 0xd2d   : > { %v1349_v36 = vpop.xlane.xlu0 %1348 }
 0xd2e   : > { %2163 = vrcp.f32 %v1349_v36 }
 0xd31   : > { %v1354_v37 = vpop.permute.xlu0 %1353 }
 0xd32   : > { %1911 = vmatpush3.bf16.msra.mxu1 %v1354_v37 }
 0xd38   : > { %v2164_v39 = vpop.eup %2163 }
 0xd39   : > { %v1351_v40 = vmul.f32 %v2164_v39, %v2162_v34 }
 0xd3b   : > { %v1352_v41 = vpack.c.bf16 %v1351_v40, %v1351_v40 }
 0xd3d   : > { %1913 = vmatmul.mubr.msk.bf16.vlgmr.msra.gmra.mrb[28].mxu1 %vm887_vm9, %v1352_v41 }
 0xe10   : > { %v1393_v49 = vpop.f32.mrb[28].mxu1 }
 0xe11   : > { %v1399_v50 = vpack.c.bf16 %v1393_v49, %v1393_v49  ;;  %v1914_v51 = vpop.f32.mrb[29].mxu1 }
 0xe12   : > { %v1396_v52 = vpop.f32.mrb[30].mxu1 }
 0xe13   : > { %1407 = vrot.lane.b32.xlu0 %v1399_v50, %s2522_s1  ;;  %v1915_v53 = vpop.f32.mrb[31].mxu1  ;;  %s2363_s1 = scalar_lea.vmem %s3126_s27, 128 }
 0xe14   : > { %p2364_p1 = scmp.ne.s32.totalorder %s3126_s27, %s2363_s1  ;;  %p2371_p2 = scmp.lt.s32.totalorder %s2369_s3, %s2363_s1 }
 0xe16   : > { %p2365_p12 = pnand %p2364_p1, %p3258_p6  ;;  %p2372_p7 = por %p2371_p2, %p2370_p5 }
 0xe18   : > { %p2366_p3 = pneg %p2365_p12 }
 0xe1a   : > { %p2373_p11 = pnand %p2372_p7, %p2366_p3 }
 0xe85   : > { %v1408_v58 = vpop.permute.xlu0 %1407 }
 0xe86   : > { %v1415_v60 = vsel %vm961_vm14, %v1413_v57, %v1408_v58 }
 0xe87   : > { %1933 = vmatmul.mubr.bf16.vlgmr.msra.gmra.mrb[4].mxu0 %v1415_v60 }
 0xf5a   : > { %v1515_v38 = vpop.f32.mrb[4].mxu0 }
 0xf5b   : > { %1521 = vst [vmem:[%s397_s24] sm:$0xff] %v1515_v38  ;;  %v1934_v61 = vpop.f32.mrb[5].mxu0 }
 0xf5c   : > { %v1518_v62 = vpop.f32.mrb[6].mxu0 }
 0xf5d   : > { %2376 = shalt.err (!%p2373_p11)
}
 0xf5e   : > { %s2377_s23 = scalar_lea.hbm %s3124_s8, 128  ;;  %s2381_s7 = scalar_lea.hbm %s3257_s22, 512 }
 0xf5f   : > { %p2378_p4 = scmp.ne.s32.totalorder %s3124_s8, %s2377_s23  ;;  %p2382_p9 = scmp.lt.u32.totalorder %s3124_s8, %s3257_s22 }
 0xf60   : > { %p2383_p8 = scmp.lt.u32.totalorder %s2381_s7, %s2377_s23  ;;  %p2385_p1 = scmp.lt.u32.totalorder %s2377_s23, %s3124_s8 }
 0xf61   : > { %p2379_p13 = pnand %p2378_p4, %p3258_p6 }
 0xf62   : > { %p2384_p10 = por %p2383_p8, %p2382_p9 }
 0xf63   : > { %p2380_p0 = pneg %p2379_p13 }
 0xf64   : > { %p2386_p12 = por %p2385_p1, %p2384_p10 }
 0xf66   : > { %p2387_p3 = pnand %p2386_p12, %p2380_p0 }
 0xf68   : > { %2390 = shalt.err (!%p2387_p3)
}
 0xf69   : > { %1962 = dma.vmem_to_hbm [thread:$0]  (%p3258_p6), %s3126_s27, 128, %s3124_s8, %s1523_s0   ;;  %v1935_v63 = vpop.f32.mrb[7].mxu0 }
 0xf6a PF: > { %s3259_s13 = sld [smem:[#allocation22_spill]]  ;;  %p2004_p5 = scmp.ge.s32.totalorder %s2497_s11, 2 }
 0xf6b   : > { %p3260_p2 = scmp.ne.s32.totalorder %s3244_s20, 0 }
 0xf6d   : > { %p1988_p7 = pnand %p2004_p5, %p3260_p2 }
 0xf70   : > { %s1550_s1 = sand.u32 1, %s3259_s13  }
 0xf71   : > { %s1551_s18 = scalar_lea.sflag [#allocation6], %s1550_s1 }
 0xf72   : > { %2452 = dma.done.wait (!%p1988_p7), %s1551_s18, 128  }
 0xf73   : > { %2454 = vsyncadd (!%p1988_p7), %s1551_s18, 4294967168  ;;  %s26_s11 = sadd.s32 1, %s2497_s11   ;;  %s3261_s24 = sld [smem:[#allocation23_spill]] }
 0xf74   : > { %p23_p11 = scmp.ge.s32.totalorder %s26_s11, 6   ;;  %s3262_s12 = smov %s2824_s25 }
 0xf75   : > { %s3263_s25 = smov %s2465_s26  ;;  %s3264_s26 = smov %s3262_s12 }
 0xf76   : > { %s3265_s27 = smov %s2473_s28  ;;  %s3266_s28 = smov %s2477_s29 }
 0xf77   : > { %s3267_s29 = smov %s2821_s21  ;;  %s3268_s30 = smov %s2489_s9 }
 0xf78   : > { %s3269_s8 = smov %s2493_s10  ;;  %s3270_s9 = smov %s3273_s19 }
 0xf79   : > { %s3271_s10 = smov %s3277_s17  ;;  %25 = sbr.rel (!%p23_p11) target bundleno = 18 (0x12), region = 124 }
 0xf80   :  { %1556 = vsyncpa [#allocation5], 1 }
 0xf81   :  { %1558 = vsyncpa [#allocation5 + $0x1], 1 }
 0xf82   :  { %1559 = vsyncpa [#allocation8], 1 }
 0xf83   :  { %1560 = vsyncpa [#allocation11], 1 }
 0xf84   :  { %1561 = vsyncpa [#allocation14], 1 }
 0xf85   :  { %1562 = vsyncpa [#allocation6], 1 }
 0xf86   :  { %1564 = vsyncpa [#allocation6 + $0x1], 1 }

</bundles_post_ra>
